<compile_context>
chip_gen: v7x
topology: tpu7x:2x2x1
jax: 0.10.0
libtpu: 0.0.40
codegen_flags: <defaults>
</compile_context>

<pallas_src>
import math
import functools

import jax
import jax.numpy as jnp
from jax import lax
from jax.experimental import pallas as pl
from jax.experimental.pallas import tpu as pltpu


# ----------------------------- Pallas kernels ------------------------------

def _noisy_linear_train_kernel(x_ref, wmu_ref, wsig_ref, eo_ref, ei_ref,
                               b_ref, o_ref):
    # Rank-1 epsilon formed on-chip: (tO,1) * (1,I) -> (tO,I). f32 combine
    # keeps the VPU path native on v5e (no bf16 VPU there).
    w_eps = eo_ref[...] * ei_ref[...]
    w_eff = wmu_ref[...] + wsig_ref[...] * w_eps                  # (tO, I) f32
    # bf16 MXU feed, f32 accumulate. Contraction over in_features of both
    # operands -> no transpose materialized (no XLU pass, no extra copy).
    y = lax.dot_general(
        x_ref[...].astype(jnp.bfloat16),
        w_eff.astype(jnp.bfloat16),
        dimension_numbers=(((1,), (1,)), ((), ())),
        preferred_element_type=jnp.float32)                       # (tB, tO)
    o_ref[...] = (y + b_ref[...]).astype(o_ref.dtype)


def _noisy_linear_eval_kernel(x_ref, wmu_ref, b_ref, o_ref):
    # Eval is a vanilla dense layer; kept in Pallas with the same
    # dot_general / bf16 / tiling treatment (plain XLA GEMM is also fine).
    y = lax.dot_general(
        x_ref[...].astype(jnp.bfloat16),
        wmu_ref[...].astype(jnp.bfloat16),
        dimension_numbers=(((1,), (1,)), ((), ())),
        preferred_element_type=jnp.float32)
    o_ref[...] = (y + b_ref[...]).astype(o_ref.dtype)


# ------------------------------ Python wrapper ------------------------------

def _pick_block(dim, candidates):
    """Largest candidate that evenly divides dim; else fall back to full dim.

    Full-dim blocks always satisfy the (8,128) BlockSpec constraint, so
    arbitrary (small / unaligned) layer sizes remain correct."""
    for c in candidates:
        if dim >= c and dim % c == 0:
            return c
    return dim


def _compiler_params():
    return pltpu.CompilerParams(
        dimension_semantics=("parallel", "parallel"),
        vmem_limit_bytes=32 * 1024 * 1024,
    )


@functools.partial(jax.jit, static_argnames=("training",))
def noisy_linear_forward(x, params, training=True):
    """x: (B, in_features). params: dict with weight_mu, weight_sigma,
    bias_mu, bias_sigma, eps_in, eps_out (factorized noise)."""
    B, I = x.shape
    O = params["weight_mu"].shape[0]

    # Hoist the (tiny, rank-1) bias combine out of the kernel.
    if training:
        bias = params["bias_mu"] + params["bias_sigma"] * params["bias_epsilon"]
    else:
        bias = params["bias_mu"]
    bias = bias.reshape(1, O)

    # Tile batch over sublanes and out_features over lanes (lane-dense output
    # stores when O is a multiple of 128). tO also sized so a (tO, I) f32
    # weight tile stays well inside v7x's 64 MiB VMEM.
    tB = _pick_block(B, (128, 64, 32, 16, 8))
    tO = _pick_block(O, (512, 256, 128))
    grid = (B // tB, O // tO)

    out_shape = jax.ShapeDtypeStruct((B, O), x.dtype)

    if training:
        eps_out = params["eps_out"].reshape(O, 1)
        eps_in = params["eps_in"].reshape(1, I)
        return pl.pallas_call(
            _noisy_linear_train_kernel,
            out_shape=out_shape,
            grid_spec=pltpu.PrefetchScalarGridSpec(
                num_scalar_prefetch=0,
                grid=grid,
                in_specs=[
                    pl.BlockSpec((tB, I), lambda i, j: (i, 0)),   # x
                    pl.BlockSpec((tO, I), lambda i, j: (j, 0)),   # W_mu
                    pl.BlockSpec((tO, I), lambda i, j: (j, 0)),   # W_sigma
                    pl.BlockSpec((tO, 1), lambda i, j: (j, 0)),   # eps_out
                    pl.BlockSpec((1, I), lambda i, j: (0, 0)),    # eps_in
                    pl.BlockSpec((1, tO), lambda i, j: (0, j)),   # bias_eff
                ],
                out_specs=pl.BlockSpec((tB, tO), lambda i, j: (i, j)),
            ),
            compiler_params=_compiler_params(),
        )(x, params["weight_mu"], params["weight_sigma"], eps_out, eps_in, bias)
    else:
        return pl.pallas_call(
            _noisy_linear_eval_kernel,
            out_shape=out_shape,
            grid_spec=pltpu.PrefetchScalarGridSpec(
                num_scalar_prefetch=0,
                grid=grid,
                in_specs=[
                    pl.BlockSpec((tB, I), lambda i, j: (i, 0)),   # x
                    pl.BlockSpec((tO, I), lambda i, j: (j, 0)),   # W_mu
                    pl.BlockSpec((1, tO), lambda i, j: (0, j)),   # bias_mu
                ],
                out_specs=pl.BlockSpec((tB, tO), lambda i, j: (i, j)),
            ),
            compiler_params=_compiler_params(),
        )(x, params["weight_mu"], bias)


# -------------------- parameter / noise init (plain JAX) --------------------

def _scale_noise(key, size):
    x = jax.random.normal(key, (size,), dtype=jnp.float32)
    return jnp.sign(x) * jnp.sqrt(jnp.abs(x))


def init_noisy_linear(key, in_features, out_features, std_init=0.5):
    k_wmu, k_bmu, k_ein, k_eout = jax.random.split(key, 4)
    mu_range = 1.0 / math.sqrt(in_features)

    weight_mu = jax.random.uniform(
        k_wmu, (out_features, in_features), jnp.float32, -mu_range, mu_range)
    weight_sigma = jnp.full((out_features, in_features),
                            std_init / math.sqrt(in_features), jnp.float32)
    bias_mu = jax.random.uniform(
        k_bmu, (out_features,), jnp.float32, -mu_range, mu_range)
    bias_sigma = jnp.full((out_features,),
                          std_init / math.sqrt(out_features), jnp.float32)

    # reset_noise: factorized Gaussian noise. The kernel only needs the
    # rank-1 factors; the dense outer product is never stored for the hot path.
    eps_in = _scale_noise(k_ein, in_features)
    eps_out = _scale_noise(k_eout, out_features)

    return {
        "weight_mu": weight_mu,
        "weight_sigma": weight_sigma,
        "bias_mu": bias_mu,
        "bias_sigma": bias_sigma,
        "eps_in": eps_in,                 # (I,)  factorized noise
        "eps_out": eps_out,               # (O,)  factorized noise
        "bias_epsilon": eps_out,          # matches torch buffer semantics
    }


# ----------------------------------- main -----------------------------------

def _check(x, params, atol, rtol):
    y_train = jax.block_until_ready(noisy_linear_forward(x, params, training=True))
    y_eval = jax.block_until_ready(noisy_linear_forward(x, params, training=False))

    # Pure-JAX f32 reference (dense epsilon rebuilt only for the check).
    w_eps = jnp.outer(params["eps_out"], params["eps_in"])
    w_eff = params["weight_mu"] + params["weight_sigma"] * w_eps
    b_eff = params["bias_mu"] + params["bias_sigma"] * params["bias_epsilon"]
    ref_train = x @ w_eff.T + b_eff
    ref_eval = x @ params["weight_mu"].T + params["bias_mu"]

    assert y_train.shape == ref_train.shape
    # bf16 MXU feed with f32 accumulation -> loose-but-tight-enough tolerance.
    assert jnp.allclose(y_train, ref_train, atol=atol, rtol=rtol), (
        float(jnp.max(jnp.abs(y_train - ref_train))))
    assert jnp.allclose(y_eval, ref_eval, atol=atol, rtol=rtol), (
        float(jnp.max(jnp.abs(y_eval - ref_eval))))


if __name__ == "__main__":
    key = jax.random.PRNGKey(0)

    # Lane/sublane-aligned Rainbow-scale head: exercises the tiled grid path
    # (grid = (1, 2) with tB=128, tO=256).
    k_param, k_x, k2_param, k2_x = jax.random.split(key, 4)
    in_features, out_features, batch = 256, 512, 128
    params = init_noisy_linear(k_param, in_features, out_features, std_init=0.5)
    x = jax.random.normal(k_x, (batch, in_features), dtype=jnp.float32)
    _check(x, params, atol=5e-2, rtol=5e-2)

    # Tiny / unaligned shapes (original demo sizes): exercises the
    # full-array-block fallback path.
    params_s = init_noisy_linear(k2_param, 32, 64, std_init=0.5)
    x_s = jax.random.normal(k2_x, (8, 32), dtype=jnp.float32)
    _check(x_s, params_s, atol=5e-2, rtol=5e-2)

    print("KERNEL_OK")
</pallas_src>

<mosaic_0001>
module attributes {stable_mosaic.version = 11 : i64} {
  func.func @_noisy_linear_train_kernel(%arg0: i32, %arg1: i32, %arg2: memref<128x256xf32, #tpu.memory_space<vmem>>, %arg3: memref<512x256xf32, #tpu.memory_space<vmem>>, %arg4: memref<512x256xf32, #tpu.memory_space<vmem>>, %arg5: memref<512x1xf32, #tpu.memory_space<vmem>>, %arg6: memref<1x256xf32, #tpu.memory_space<vmem>>, %arg7: memref<1x512xf32, #tpu.memory_space<vmem>>, %arg8: memref<128x512xf32, #tpu.memory_space<vmem>>) attributes {dimension_semantics = [#tpu.dimension_semantics<parallel>, #tpu.dimension_semantics<parallel>], iteration_bounds = array<i64: 1, 1>, scalar_prefetch = 0 : i64, scratch_operands = 0 : i64, tpu.core_type = #tpu.core_type<tc>, window_params = [{transform_indices = @transform_0, window_bounds = array<i64: 128, 256>}, {transform_indices = @transform_1, window_bounds = array<i64: 512, 256>}, {transform_indices = @transform_2, window_bounds = array<i64: 512, 256>}, {transform_indices = @transform_3, window_bounds = array<i64: 512, 1>}, {pipeline_mode = #tpu.pipeline_mode<synchronous>, transform_indices = @transform_4, window_bounds = array<i64: 1, 256>}, {transform_indices = @transform_5, window_bounds = array<i64: 1, 512>}, {transform_indices = @transform_6, window_bounds = array<i64: 128, 512>}]} {
    %c0 = arith.constant 0 : index
    %c0_0 = arith.constant 0 : index
    %0 = vector.load %arg5[%c0, %c0_0] : memref<512x1xf32, #tpu.memory_space<vmem>>, vector<512x1xf32>
    %c0_1 = arith.constant 0 : index
    %c0_2 = arith.constant 0 : index
    %1 = vector.load %arg6[%c0_1, %c0_2] : memref<1x256xf32, #tpu.memory_space<vmem>>, vector<1x256xf32>
    %2 = vector.broadcast %0 : vector<512x1xf32> to vector<512x256xf32>
    %3 = vector.broadcast %1 : vector<1x256xf32> to vector<512x256xf32>
    %4 = arith.mulf %2, %3 : vector<512x256xf32>
    %c0_3 = arith.constant 0 : index
    %c0_4 = arith.constant 0 : index
    %5 = vector.load %arg3[%c0_3, %c0_4] : memref<512x256xf32, #tpu.memory_space<vmem>>, vector<512x256xf32>
    %c0_5 = arith.constant 0 : index
    %c0_6 = arith.constant 0 : index
    %6 = vector.load %arg4[%c0_5, %c0_6] : memref<512x256xf32, #tpu.memory_space<vmem>>, vector<512x256xf32>
    %7 = arith.mulf %6, %4 : vector<512x256xf32>
    %8 = arith.addf %5, %7 : vector<512x256xf32>
    %c0_7 = arith.constant 0 : index
    %c0_8 = arith.constant 0 : index
    %9 = vector.load %arg2[%c0_7, %c0_8] : memref<128x256xf32, #tpu.memory_space<vmem>>, vector<128x256xf32>
    %10 = arith.truncf %9 : vector<128x256xf32> to vector<128x256xbf16>
    %11 = arith.truncf %8 : vector<512x256xf32> to vector<512x256xbf16>
    %cst = arith.constant dense<0.000000e+00> : vector<128x512xf32>
    %12 = tpu.matmul %10, %11, %cst {dimension_numbers = #tpu.dot_dimension_numbers<[1], [1], [0], [0], [0, 0, 1, 0], [], []>} : vector<128x256xbf16>, vector<512x256xbf16>, vector<128x512xf32> -> vector<128x512xf32>
    %c0_9 = arith.constant 0 : index
    %c0_10 = arith.constant 0 : index
    %13 = vector.load %arg7[%c0_9, %c0_10] : memref<1x512xf32, #tpu.memory_space<vmem>>, vector<1x512xf32>
    %14 = vector.broadcast %13 : vector<1x512xf32> to vector<128x512xf32>
    %15 = arith.addf %12, %14 : vector<128x512xf32>
    %c0_11 = arith.constant 0 : index
    %c0_12 = arith.constant 0 : index
    %16 = vector.load %arg8[%c0_11, %c0_12] : memref<128x512xf32, #tpu.memory_space<vmem>>, vector<128x512xf32>
    tpu.vector_store %arg8[%c0_11, %c0_12], %15 {strides = array<i32>} : memref<128x512xf32, #tpu.memory_space<vmem>>, vector<128x512xf32>,
    return
  }
  func.func @transform_0(%arg0: i32, %arg1: i32) -> (i32, i32) {
    %c0_i32 = arith.constant 0 : i32
    %c0_i32_0 = arith.constant 0 : i32
    return %arg0, %c0_i32 : i32, i32
  }
  func.func @transform_1(%arg0: i32, %arg1: i32) -> (i32, i32) {
    %c0_i32 = arith.constant 0 : i32
    %c0_i32_0 = arith.constant 0 : i32
    return %arg1, %c0_i32 : i32, i32
  }
  func.func @transform_2(%arg0: i32, %arg1: i32) -> (i32, i32) {
    %c0_i32 = arith.constant 0 : i32
    %c0_i32_0 = arith.constant 0 : i32
    return %arg1, %c0_i32 : i32, i32
  }
  func.func @transform_3(%arg0: i32, %arg1: i32) -> (i32, i32) {
    %c0_i32 = arith.constant 0 : i32
    %c0_i32_0 = arith.constant 0 : i32
    return %arg1, %c0_i32 : i32, i32
  }
  func.func @transform_4(%arg0: i32, %arg1: i32) -> (i32, i32) {
    %c0_i32 = arith.constant 0 : i32
    %c0_i32_0 = arith.constant 0 : i32
    %c0_i32_1 = arith.constant 0 : i32
    return %c0_i32, %c0_i32_0 : i32, i32
  }
  func.func @transform_5(%arg0: i32, %arg1: i32) -> (i32, i32) {
    %c0_i32 = arith.constant 0 : i32
    %c0_i32_0 = arith.constant 0 : i32
    return %c0_i32, %arg1 : i32, i32
  }
  func.func @transform_6(%arg0: i32, %arg1: i32) -> (i32, i32) {
    %c0_i32 = arith.constant 0 : i32
    return %arg0, %arg1 : i32, i32
  }
}

</mosaic_0001>

<bundles_post_ra>
// kernel: noisy_linear_forward.1
= control target key start
LH: loop header
LB: loop body
LE: loop exit
PB: predicated region body
PF: predicated region fallthrough
CT: control target
= control target key end

     0   :  { %11 = vsyncpa [#allocation3], 0  ;;  %s2206_s0 = inlined_call_operand.vmem [shape: f32[128,256], index: 0, kind: input, shape index: {}]   ;;  %s2207_s1 = inlined_call_operand.hbm [shape: f32[512,256], index: 1, kind: input, shape index: {}]   ;;  %s2208_s2 = inlined_call_operand.hbm [shape: f32[512,256], index: 2, kind: input, shape index: {}]   ;;  %s2209_s3 = inlined_call_operand.vmem [shape: f32[512,1], index: 3, kind: input, shape index: {}]   ;;  %s2210_s4 = inlined_call_operand.vmem [shape: f32[1,256], index: 4, kind: input, shape index: {}]   ;;  %s2211_s5 = inlined_call_operand.vmem [shape: f32[1,512], index: 5, kind: input, shape index: {}]   ;;  %s2212_s6 = inlined_call_operand.hbm [shape: f32[128,512], index: 6, kind: output, shape index: {}]  }
   0x1   :  { %12 = vsyncpa [#allocation6], 0 }
   0x2   :  { %13 = vsyncpa [#allocation4], 0  ;;  %s1612_s21 = smov [#allocation2]   ;;  %s1540_s25 = scalar_lea.hbm %s2207_s1, 16384 }
   0x3   :  { %s21_s22 = sshll.u32 %s1612_s21, 4  ;;  %p1541_p0 = scmp.ne.s32.totalorder %s2207_s1, %s1540_s25  ;;  %s22_s22 = int_to_ptr.vmem [resolvable:$true] %s21_s22 }
   0x4   :  { %p1544_p1 = scmp.lt.u32.totalorder %s1540_s25, %s2207_s1 }
   0x6   :  { %p1546_p2 = pnand %p1544_p1, %p1541_p0 }
   0x8   :  { %1549 = shalt.err (!%p1546_p2)
}
   0x9   :  { %s1550_s30 = scalar_lea.vmem %s22_s22, 16384  ;;  %p1555_p4 = scmp.lt.s32.totalorder %s22_s22, %s22_s22 }
   0xa   :  { %p1551_p3 = scmp.ne.s32.totalorder %s22_s22, %s1550_s30  ;;  %p1556_p5 = scmp.lt.s32.totalorder %s1550_s30, %s1550_s30 }
   0xc   :  { %p1557_p6 = por %p1556_p5, %p1555_p4 }
   0xe   :  { %p1558_p7 = pnand %p1557_p6, %p1551_p3 }
  0x10   :  { %1561 = shalt.err (!%p1558_p7)
}
  0x11   :  { %s1613_s7 = smov 256   ;;  %s1614_s8 = smov 16  }
  0x12   :  { %27 = dma.hbm_to_vmem [thread:$0]  %s2207_s1, 16384, %s22_s22, [#allocation3], %s1613_s7, %s1613_s7, %s1614_s8  }
  0x13   :  { %s1615_s11 = smov [#allocation5]   ;;  %s1562_s15 = scalar_lea.hbm %s2208_s2, 16384 }
  0x14   :  { %s33_s12 = sshll.u32 %s1615_s11, 4  ;;  %p1563_p8 = scmp.ne.s32.totalorder %s2208_s2, %s1562_s15  ;;  %s34_s12 = int_to_ptr.vmem [resolvable:$true] %s33_s12 }
  0x15   :  { %p1566_p9 = scmp.lt.u32.totalorder %s1562_s15, %s2208_s2 }
  0x17   :  { %p1568_p10 = pnand %p1566_p9, %p1563_p8 }
  0x19   :  { %1571 = shalt.err (!%p1568_p10)
}
  0x1a   :  { %s1572_s20 = scalar_lea.vmem %s34_s12, 16384  ;;  %p1577_p12 = scmp.lt.s32.totalorder %s34_s12, %s34_s12 }
  0x1b   :  { %p1573_p11 = scmp.ne.s32.totalorder %s34_s12, %s1572_s20  ;;  %p1578_p13 = scmp.lt.s32.totalorder %s1572_s20, %s1572_s20 }
  0x1d   :  { %p1579_p0 = por %p1578_p13, %p1577_p12 }
  0x1f   :  { %p1580_p1 = pnand %p1579_p0, %p1573_p11 }
  0x21   :  { %1583 = shalt.err (!%p1580_p1)
}
  0x22   :  { %39 = dma.hbm_to_vmem [thread:$0]  %s2208_s2, 16384, %s34_s12, [#allocation6], %s1613_s7, %s1613_s7, %s1614_s8  }
  0x23   :  { %1606 = dma.done.wait [#allocation3], 16384  }
  0x24   :  { %1607 = vsyncadd [#allocation3], 4294950912 }
  0x25   :  { %1608 = dma.done.wait [#allocation6], 16384  }
  0x26   :  { %1609 = vsyncadd [#allocation6], 4294950912  ;;  %v1616_v0 = vmov 0   ;;  %v84_v1 = vld [vmem:[%s2209_s3 + $0x100] sm:$0xff]  ;;  %v85_v3 = vld [vmem:[%s2209_s3 + $0x108] sm:$0xff]  ;;  %v438_v59 = vlaneseq }
  0x27   :  { %1539 = vset.pattern.permute.xlu1 %v1616_v0  ;;  %1538 = vset.pattern.permute.xlu0 %v1616_v0  ;;  %v52_v2 = vld [vmem:[%s2209_s3] sm:$0xff]  ;;  %v53_v4 = vld [vmem:[%s2209_s3 + $0x8] sm:$0xff]  ;;  %v55_v5 = vld [vmem:[%s2209_s3 + $0x18] sm:$0xff] }
  0x28   :  { %279 = vperm.xlu1 %1539, %v84_v1   ;;  %119 = vperm.xlu0 %1538, %v52_v2   ;;  %v54_v6 = vld [vmem:[%s2209_s3 + $0x10] sm:$0xff]  ;;  %v87_v7 = vld [vmem:[%s2209_s3 + $0x118] sm:$0xff]  ;;  %v57_v9 = vld [vmem:[%s2209_s3 + $0x28] sm:$0xff]  ;;  %v1859_v62 = vshrl.u32 %v438_v59, 7 }
  0x29   :  { %v86_v8 = vld [vmem:[%s2209_s3 + $0x110] sm:$0xff]  ;;  %v56_v10 = vld [vmem:[%s2209_s3 + $0x20] sm:$0xff]  ;;  %v89_v11 = vld [vmem:[%s2209_s3 + $0x128] sm:$0xff] }
  0x2a   :  { %v88_v12 = vld [vmem:[%s2209_s3 + $0x120] sm:$0xff]  ;;  %v59_v13 = vld [vmem:[%s2209_s3 + $0x38] sm:$0xff]  ;;  %v58_v14 = vld [vmem:[%s2209_s3 + $0x30] sm:$0xff]  ;;  %v440_v1 = vsub.s32 0, %v1859_v62  ;;  %v444_v2 = vsub.s32 1, %v1859_v62 }
  0x2b   :  { %v91_v15 = vld [vmem:[%s2209_s3 + $0x138] sm:$0xff]  ;;  %v90_v16 = vld [vmem:[%s2209_s3 + $0x130] sm:$0xff]  ;;  %v61_v17 = vld [vmem:[%s2209_s3 + $0x48] sm:$0xff] }
  0x2c   :  { %284 = vperm.xlu1 %1539, %v85_v3   ;;  %124 = vperm.xlu0 %1538, %v53_v4   ;;  %v60_v18 = vld [vmem:[%s2209_s3 + $0x40] sm:$0xff]  ;;  %v93_v19 = vld [vmem:[%s2209_s3 + $0x148] sm:$0xff]  ;;  %v63_v21 = vld [vmem:[%s2209_s3 + $0x58] sm:$0xff] }
  0x2d   :  { %v92_v20 = vld [vmem:[%s2209_s3 + $0x140] sm:$0xff]  ;;  %v62_v22 = vld [vmem:[%s2209_s3 + $0x50] sm:$0xff]  ;;  %v95_v23 = vld [vmem:[%s2209_s3 + $0x158] sm:$0xff] }
  0x2e   :  { %v94_v24 = vld [vmem:[%s2209_s3 + $0x150] sm:$0xff]  ;;  %v65_v25 = vld [vmem:[%s2209_s3 + $0x68] sm:$0xff]  ;;  %v64_v26 = vld [vmem:[%s2209_s3 + $0x60] sm:$0xff] }
  0x2f   :  { %v97_v27 = vld [vmem:[%s2209_s3 + $0x168] sm:$0xff]  ;;  %v96_v28 = vld [vmem:[%s2209_s3 + $0x160] sm:$0xff]  ;;  %v67_v29 = vld [vmem:[%s2209_s3 + $0x78] sm:$0xff] }
  0x30   :  { %134 = vperm.xlu1 %1539, %v55_v5   ;;  %129 = vperm.xlu0 %1538, %v54_v6   ;;  %v66_v30 = vld [vmem:[%s2209_s3 + $0x70] sm:$0xff]  ;;  %v99_v31 = vld [vmem:[%s2209_s3 + $0x178] sm:$0xff]  ;;  %v69_v33 = vld [vmem:[%s2209_s3 + $0x88] sm:$0xff] }
  0x31   :  { %v98_v32 = vld [vmem:[%s2209_s3 + $0x170] sm:$0xff]  ;;  %v68_v34 = vld [vmem:[%s2209_s3 + $0x80] sm:$0xff]  ;;  %v101_v35 = vld [vmem:[%s2209_s3 + $0x188] sm:$0xff] }
  0x32   :  { %v100_v36 = vld [vmem:[%s2209_s3 + $0x180] sm:$0xff]  ;;  %v71_v37 = vld [vmem:[%s2209_s3 + $0x98] sm:$0xff]  ;;  %v70_v38 = vld [vmem:[%s2209_s3 + $0x90] sm:$0xff] }
  0x33   :  { %v103_v39 = vld [vmem:[%s2209_s3 + $0x198] sm:$0xff]  ;;  %v102_v40 = vld [vmem:[%s2209_s3 + $0x190] sm:$0xff]  ;;  %v73_v41 = vld [vmem:[%s2209_s3 + $0xa8] sm:$0xff] }
  0x34   :  { %294 = vperm.xlu1 %1539, %v87_v7   ;;  %289 = vperm.xlu0 %1538, %v86_v8   ;;  %v72_v42 = vld [vmem:[%s2209_s3 + $0xa0] sm:$0xff]  ;;  %v105_v43 = vld [vmem:[%s2209_s3 + $0x1a8] sm:$0xff]  ;;  %v75_v45 = vld [vmem:[%s2209_s3 + $0xb8] sm:$0xff] }
  0x35   :  { %v104_v44 = vld [vmem:[%s2209_s3 + $0x1a0] sm:$0xff]  ;;  %v74_v46 = vld [vmem:[%s2209_s3 + $0xb0] sm:$0xff]  ;;  %v107_v47 = vld [vmem:[%s2209_s3 + $0x1b8] sm:$0xff] }
  0x36   :  { %v106_v48 = vld [vmem:[%s2209_s3 + $0x1b0] sm:$0xff]  ;;  %v77_v49 = vld [vmem:[%s2209_s3 + $0xc8] sm:$0xff]  ;;  %v76_v50 = vld [vmem:[%s2209_s3 + $0xc0] sm:$0xff] }
  0x37   :  { %v109_v51 = vld [vmem:[%s2209_s3 + $0x1c8] sm:$0xff]  ;;  %v108_v52 = vld [vmem:[%s2209_s3 + $0x1c0] sm:$0xff]  ;;  %v79_v53 = vld [vmem:[%s2209_s3 + $0xd8] sm:$0xff] }
  0x38   :  { %144 = vperm.xlu1 %1539, %v57_v9   ;;  %139 = vperm.xlu0 %1538, %v56_v10   ;;  %v78_v54 = vld [vmem:[%s2209_s3 + $0xd0] sm:$0xff]  ;;  %v111_v55 = vld [vmem:[%s2209_s3 + $0x1d8] sm:$0xff]  ;;  %v81_v57 = vld [vmem:[%s2209_s3 + $0xe8] sm:$0xff] }
  0x39   :  { %v110_v56 = vld [vmem:[%s2209_s3 + $0x1d0] sm:$0xff]  ;;  %v80_v58 = vld [vmem:[%s2209_s3 + $0xe0] sm:$0xff]  ;;  %v113_v60 = vld [vmem:[%s2209_s3 + $0x1e8] sm:$0xff] }
  0x3a   :  { %v112_v61 = vld [vmem:[%s2209_s3 + $0x1e0] sm:$0xff]  ;;  %v83_v63 = vld [vmem:[%s2209_s3 + $0xf8] sm:$0xff]  ;;  %v82_v0 = vld [vmem:[%s2209_s3 + $0xf0] sm:$0xff] }
  0x3b   :  { %v115_v3 = vld [vmem:[%s2209_s3 + $0x1f8] sm:$0xff]  ;;  %v114_v4 = vld [vmem:[%s2209_s3 + $0x1f0] sm:$0xff]  ;;  %v116_v5 = vld [vmem:[%s2210_s4] sm:$0x3] }
  0x3c   :  { %304 = vperm.xlu1 %1539, %v89_v11   ;;  %299 = vperm.xlu0 %1538, %v88_v12   ;;  %v1880_v6 = vrot.slane %v116_v5, %v440_v1  ;;  %v1884_v7 = vrot.slane %v116_v5, %v444_v2  ;;  %v768_v8 = vld [vmem:[#allocation5 + $0x200] sm:$0xff]  ;;  %v769_v11 = vld [vmem:[#allocation5 + $0x208] sm:$0xff]  ;;  %v583_v59 = vld [vmem:[#allocation2 + $0x38] sm:$0xff] }
  0x40   :  { %154 = vperm.xlu1 %1539, %v59_v13   ;;  %149 = vperm.xlu0 %1538, %v58_v14   ;;  %v704_v14 = vld [vmem:[#allocation5] sm:$0xff] }
  0x44   :  { %314 = vperm.xlu1 %1539, %v91_v15   ;;  %309 = vperm.xlu0 %1538, %v90_v16   ;;  %v705_v15 = vld [vmem:[#allocation5 + $0x8] sm:$0xff] }
  0x48   :  { %164 = vperm.xlu1 %1539, %v61_v17   ;;  %159 = vperm.xlu0 %1538, %v60_v18   ;;  %v770_v18 = vld [vmem:[#allocation5 + $0x210] sm:$0xff] }
  0x4c   :  { %324 = vperm.xlu1 %1539, %v93_v19   ;;  %319 = vperm.xlu0 %1538, %v92_v20   ;;  %v771_v19 = vld [vmem:[#allocation5 + $0x218] sm:$0xff] }
  0x50   :  { %174 = vperm.xlu1 %1539, %v63_v21   ;;  %169 = vperm.xlu0 %1538, %v62_v22  }
  0x54   :  { %334 = vperm.xlu1 %1539, %v95_v23   ;;  %329 = vperm.xlu0 %1538, %v94_v24  }
  0x58   :  { %184 = vperm.xlu1 %1539, %v65_v25   ;;  %179 = vperm.xlu0 %1538, %v64_v26   ;;  %v706_v25 = vld [vmem:[#allocation5 + $0x10] sm:$0xff]  ;;  %v707_v26 = vld [vmem:[#allocation5 + $0x18] sm:$0xff] }
  0x5c   :  { %344 = vperm.xlu1 %1539, %v97_v27   ;;  %339 = vperm.xlu0 %1538, %v96_v28   ;;  %v577_v28 = vld [vmem:[#allocation2 + $0x8] sm:$0xff] }
  0x60   :  { %194 = vperm.xlu1 %1539, %v67_v29   ;;  %189 = vperm.xlu0 %1538, %v66_v30  }
  0x64   :  { %354 = vperm.xlu1 %1539, %v99_v31   ;;  %349 = vperm.xlu0 %1538, %v98_v32  }
  0x68   :  { %204 = vperm.xlu1 %1539, %v69_v33   ;;  %199 = vperm.xlu0 %1538, %v68_v34   ;;  %v641_v33 = vld [vmem:[#allocation2 + $0x208] sm:$0xff]  ;;  %v576_v34 = vld [vmem:[#allocation2] sm:$0xff] }
  0x6c   :  { %364 = vperm.xlu1 %1539, %v101_v35   ;;  %359 = vperm.xlu0 %1538, %v100_v36   ;;  %v640_v35 = vld [vmem:[#allocation2 + $0x200] sm:$0xff]  ;;  %v710_v36 = vld [vmem:[#allocation5 + $0x30] sm:$0xff] }
  0x70   :  { %214 = vperm.xlu1 %1539, %v71_v37   ;;  %209 = vperm.xlu0 %1538, %v70_v38   ;;  %v579_v37 = vld [vmem:[#allocation2 + $0x18] sm:$0xff] }
  0x74   :  { %374 = vperm.xlu1 %1539, %v103_v39   ;;  %369 = vperm.xlu0 %1538, %v102_v40  }
  0x78   :  { %224 = vperm.xlu1 %1539, %v73_v41   ;;  %219 = vperm.xlu0 %1538, %v72_v42   ;;  %v643_v42 = vld [vmem:[#allocation2 + $0x218] sm:$0xff] }
  0x7c   :  { %384 = vperm.xlu1 %1539, %v105_v43   ;;  %379 = vperm.xlu0 %1538, %v104_v44   ;;  %v578_v43 = vld [vmem:[#allocation2 + $0x10] sm:$0xff] }
  0x7d   :  { %v642_v44 = vld [vmem:[#allocation2 + $0x210] sm:$0xff] }
  0x80   :  { %234 = vperm.xlu1 %1539, %v75_v45   ;;  %229 = vperm.xlu0 %1538, %v74_v46   ;;  %v711_v45 = vld [vmem:[#allocation5 + $0x38] sm:$0xff] }
  0x84   :  { %394 = vperm.xlu1 %1539, %v107_v47   ;;  %389 = vperm.xlu0 %1538, %v106_v48   ;;  %v708_v47 = vld [vmem:[#allocation5 + $0x20] sm:$0xff]  ;;  %v709_v48 = vld [vmem:[#allocation5 + $0x28] sm:$0xff] }
  0x88   :  { %244 = vperm.xlu1 %1539, %v77_v49   ;;  %239 = vperm.xlu0 %1538, %v76_v50  }
  0x8c   :  { %404 = vperm.xlu1 %1539, %v109_v51   ;;  %399 = vperm.xlu0 %1538, %v108_v52  }
  0x90   :  { %254 = vperm.xlu1 %1539, %v79_v53   ;;  %249 = vperm.xlu0 %1538, %v78_v54  }
  0x94   :  { %414 = vperm.xlu1 %1539, %v111_v55   ;;  %409 = vperm.xlu0 %1538, %v110_v56  }
  0x98   :  { %264 = vperm.xlu1 %1539, %v81_v57   ;;  %259 = vperm.xlu0 %1538, %v80_v58   ;;  %v582_v58 = vld [vmem:[#allocation2 + $0x30] sm:$0xff] }
  0x9c   :  { %424 = vperm.xlu1 %1539, %v113_v60   ;;  %419 = vperm.xlu0 %1538, %v112_v61   ;;  %v581_v60 = vld [vmem:[#allocation2 + $0x28] sm:$0xff] }
  0xa0   :  { %274 = vperm.xlu1 %1539, %v83_v63   ;;  %269 = vperm.xlu0 %1538, %v82_v0  }
  0xa4   :  { %434 = vperm.xlu1 %1539, %v115_v3   ;;  %429 = vperm.xlu0 %1538, %v114_v4  }
  0xa7   :  { %v280_v9 = vpop.permute.xlu1 %279  ;;  %v120_v10 = vpop.permute.xlu0 %119 }
  0xa8   :  { %v512_v12 = vmul.f32 %v1880_v6, %v280_v9  ;;  %v513_v13 = vmul.f32 %v1884_v7, %v280_v9  ;;  %v448_v16 = vmul.f32 %v1880_v6, %v120_v10  ;;  %v449_v17 = vmul.f32 %v1884_v7, %v120_v10 }
  0xaa   :  { %v896_v20 = vmul.f32 %v768_v8, %v512_v12  ;;  %v897_v21 = vmul.f32 %v769_v11, %v513_v13  ;;  %v832_v22 = vmul.f32 %v704_v14, %v448_v16  ;;  %v833_v23 = vmul.f32 %v705_v15, %v449_v17  ;;  %v580_v8 = vld [vmem:[#allocation2 + $0x20] sm:$0xff]  ;;  %v774_v11 = vld [vmem:[#allocation5 + $0x230] sm:$0xff] }
  0xab   :  { %v285_v24 = vpop.permute.xlu1 %284  ;;  %v125_v27 = vpop.permute.xlu0 %124 }
  0xac   :  { %v514_v29 = vmul.f32 %v1880_v6, %v285_v24  ;;  %v515_v30 = vmul.f32 %v1884_v7, %v285_v24  ;;  %v450_v31 = vmul.f32 %v1880_v6, %v125_v27  ;;  %v451_v32 = vmul.f32 %v1884_v7, %v125_v27  ;;  %v772_v24 = vld [vmem:[#allocation5 + $0x220] sm:$0xff]  ;;  %v647_v27 = vld [vmem:[#allocation2 + $0x238] sm:$0xff] }
  0xad   :  { %v961_v50 = vadd.f32 %v833_v23, %v577_v28  ;;  %v1025_v51 = vadd.f32 %v897_v21, %v641_v33  ;;  %v960_v52 = vadd.f32 %v832_v22, %v576_v34  ;;  %v1024_v53 = vadd.f32 %v896_v20, %v640_v35  ;;  %v775_v23 = vld [vmem:[#allocation5 + $0x238] sm:$0xff]  ;;  %v644_v33 = vld [vmem:[#allocation2 + $0x220] sm:$0xff]  ;;  %v645_v34 = vld [vmem:[#allocation2 + $0x228] sm:$0xff] }
  0xae   :  { %v898_v38 = vmul.f32 %v770_v18, %v514_v29  ;;  %v899_v39 = vmul.f32 %v771_v19, %v515_v30  ;;  %v834_v40 = vmul.f32 %v706_v25, %v450_v31  ;;  %v835_v41 = vmul.f32 %v707_v26, %v451_v32  ;;  %v1089_v18 = vld [vmem:[%s2206_s0 + $0x8] sm:$0xff]  ;;  %v1091_v19 = vld [vmem:[%s2206_s0 + $0x18] sm:$0xff]  ;;  %v646_v26 = vld [vmem:[#allocation2 + $0x230] sm:$0xff] }
  0xaf   :  { %v135_v46 = vpop.permute.xlu1 %134  ;;  %v130_v49 = vpop.permute.xlu0 %129  ;;  %v773_v25 = vld [vmem:[#allocation5 + $0x228] sm:$0xff]  ;;  %v714_v35 = vld [vmem:[#allocation5 + $0x50] sm:$0xff] }
  0xb0   :  { %v454_v54 = vmul.f32 %v1880_v6, %v135_v46  ;;  %v455_v55 = vmul.f32 %v1884_v7, %v135_v46  ;;  %v452_v56 = vmul.f32 %v1880_v6, %v130_v49  ;;  %v453_v57 = vmul.f32 %v1884_v7, %v130_v49 }
  0xb1   :  { %v963_v61 = vadd.f32 %v835_v41, %v579_v37  ;;  %v1027_v63 = vadd.f32 %v899_v39, %v643_v42  ;;  %v962_v0 = vadd.f32 %v834_v40, %v578_v43  ;;  %v1026_v3 = vadd.f32 %v898_v38, %v642_v44  ;;  %v715_v42 = vld [vmem:[#allocation5 + $0x58] sm:$0xff]  ;;  %v712_v44 = vld [vmem:[#allocation5 + $0x40] sm:$0xff] }
  0xb2   :  { %v838_v4 = vmul.f32 %v710_v36, %v454_v54  ;;  %v839_v5 = vmul.f32 %v711_v45, %v455_v55  ;;  %v836_v9 = vmul.f32 %v708_v47, %v452_v56  ;;  %v837_v10 = vmul.f32 %v709_v48, %v453_v57  ;;  %v713_v45 = vld [vmem:[#allocation5 + $0x48] sm:$0xff]  ;;  %v587_v55 = vld [vmem:[#allocation2 + $0x58] sm:$0xff] }
  0xb3   :  { %v295_v12 = vpop.permute.xlu1 %294  ;;  %v290_v13 = vpop.permute.xlu0 %289  ;;  %v1137_v14 = vpack.c.bf16 %v963_v61, %v961_v50  ;;  %v1169_v15 = vpack.c.bf16 %v1027_v63, %v1025_v51  ;;  %v1136_v16 = vpack.c.bf16 %v962_v0, %v960_v52  ;;  %v1168_v17 = vpack.c.bf16 %v1026_v3, %v1024_v53  ;;  %v585_v56 = vld [vmem:[#allocation2 + $0x48] sm:$0xff]  ;;  %v586_v61 = vld [vmem:[#allocation2 + $0x50] sm:$0xff]  ;;  %v584_v63 = vld [vmem:[#allocation2 + $0x40] sm:$0xff] }
  0xb4   :  { %v1904_v20 = vadd.f32 %v838_v4, %v582_v58  ;;  %v967_v21 = vadd.f32 %v839_v5, %v583_v59  ;;  %v965_v22 = vadd.f32 %v837_v10, %v581_v60  ;;  %v518_v28 = vmul.f32 %v1880_v6, %v295_v12  ;;  %v778_v0 = vld [vmem:[#allocation5 + $0x250] sm:$0xff] }
  0xb5   :  { %v519_v29 = vmul.f32 %v1884_v7, %v295_v12  ;;  %v516_v30 = vmul.f32 %v1880_v6, %v290_v13  ;;  %v517_v31 = vmul.f32 %v1884_v7, %v290_v13  ;;  %1222 = vmatprep.subr.bf16.mxu0 %v1137_v14  ;;  %v964_v32 = vadd.f32 %v836_v9, %v580_v8  ;;  %v776_v12 = vld [vmem:[#allocation5 + $0x240] sm:$0xff]  ;;  %v777_v13 = vld [vmem:[#allocation5 + $0x248] sm:$0xff] }
  0xb6   :  { %1335 = vmatprep.subr.bf16.mxu1 %v1169_v15  ;;  %1223 = vmatpush1.bf16.xpose.msra.mxu0 %v1136_v16  ;;  %v1139_v36 = vpack.c.bf16 %v967_v21, %v965_v22  ;;  %v1121_v37 = vpack.c.bf16 %v1091_v19, %v1089_v18  ;;  %v902_v38 = vmul.f32 %v774_v11, %v518_v28  ;;  %v779_v11 = vld [vmem:[#allocation5 + $0x258] sm:$0xff]  ;;  %v650_v15 = vld [vmem:[#allocation2 + $0x250] sm:$0xff] }
  0xb7   :  { %v903_v39 = vmul.f32 %v775_v23, %v519_v29  ;;  %v900_v40 = vmul.f32 %v772_v24, %v516_v30  ;;  %v901_v41 = vmul.f32 %v773_v25, %v517_v31  ;;  %1336 = vmatpush1.bf16.xpose.msra.mxu1 %v1168_v17  ;;  %v145_v43 = vpop.permute.xlu1 %144  ;;  %v140_v46 = vpop.permute.xlu0 %139  ;;  %v1138_v14 = vpack.c.bf16 %v1904_v20, %v964_v32  ;;  %v651_v16 = vld [vmem:[#allocation2 + $0x258] sm:$0xff]  ;;  %v648_v24 = vld [vmem:[#allocation2 + $0x240] sm:$0xff]  ;;  %v649_v25 = vld [vmem:[#allocation2 + $0x248] sm:$0xff] }
  0xb8   :  { %v458_v47 = vmul.f32 %v1880_v6, %v145_v43  ;;  %v459_v48 = vmul.f32 %v1884_v7, %v145_v43  ;;  %v456_v49 = vmul.f32 %v1880_v6, %v140_v46  ;;  %v457_v50 = vmul.f32 %v1884_v7, %v140_v46  ;;  %1224 = vmatprep.subr.bf16.mxu0 %v1139_v36  ;;  %v719_v31 = vld [vmem:[#allocation5 + $0x78] sm:$0xff] }
  0xb9   :  { %v1030_v51 = vadd.f32 %v902_v38, %v646_v26  ;;  %v1031_v52 = vadd.f32 %v903_v39, %v647_v27  ;;  %v1028_v53 = vadd.f32 %v900_v40, %v644_v33  ;;  %v1029_v54 = vadd.f32 %v901_v41, %v645_v34  ;;  %1254 = vmatprep.mubr.bf16.mxu0 %v1121_v37  ;;  %v718_v26 = vld [vmem:[#allocation5 + $0x70] sm:$0xff]  ;;  %v716_v33 = vld [vmem:[#allocation5 + $0x60] sm:$0xff]  ;;  %v717_v34 = vld [vmem:[#allocation5 + $0x68] sm:$0xff] }
  0xba   :  { %v842_v57 = vmul.f32 %v714_v35, %v458_v47  ;;  %v843_v58 = vmul.f32 %v715_v42, %v459_v48  ;;  %v840_v59 = vmul.f32 %v712_v44, %v456_v49  ;;  %v841_v60 = vmul.f32 %v713_v45, %v457_v50  ;;  %1367 = vmatprep.mubr.bf16.mxu1 %v1121_v37  ;;  %v591_v44 = vld [vmem:[#allocation2 + $0x78] sm:$0xff]  ;;  %v589_v45 = vld [vmem:[#allocation2 + $0x68] sm:$0xff]  ;;  %v590_v50 = vld [vmem:[#allocation2 + $0x70] sm:$0xff] }
  0xbb   :  { %v305_v3 = vpop.permute.xlu1 %304  ;;  %v300_v4 = vpop.permute.xlu0 %299  ;;  %v1171_v5 = vpack.c.bf16 %v1031_v52, %v1029_v54  ;;  %v1170_v8 = vpack.c.bf16 %v1030_v51, %v1028_v53  ;;  %v588_v51 = vld [vmem:[#allocation2 + $0x60] sm:$0xff]  ;;  %v782_v52 = vld [vmem:[#allocation5 + $0x270] sm:$0xff] }
  0xbc   :  { %v971_v9 = vadd.f32 %v843_v58, %v587_v55  ;;  %v969_v10 = vadd.f32 %v841_v60, %v585_v56  ;;  %v522_v17 = vmul.f32 %v1880_v6, %v305_v3  ;;  %v523_v18 = vmul.f32 %v1884_v7, %v305_v3  ;;  %v780_v60 = vld [vmem:[#allocation5 + $0x260] sm:$0xff]  ;;  %v655_v3 = vld [vmem:[#allocation2 + $0x278] sm:$0xff] }
  0xbd   :  { %v520_v19 = vmul.f32 %v1880_v6, %v300_v4  ;;  %v521_v21 = vmul.f32 %v1884_v7, %v300_v4  ;;  %1337 = vmatprep.subr.bf16.mxu1 %v1171_v5  ;;  %v970_v22 = vadd.f32 %v842_v57, %v586_v61  ;;  %v968_v23 = vadd.f32 %v840_v59, %v584_v63  ;;  %v783_v59 = vld [vmem:[#allocation5 + $0x278] sm:$0xff]  ;;  %v781_v61 = vld [vmem:[#allocation5 + $0x268] sm:$0xff] }
  0xbe   :  { %1225 = vmatpush1.bf16.xpose.msra.mxu0 %v1138_v14  ;;  %v1141_v27 = vpack.c.bf16 %v971_v9, %v969_v10  ;;  %v906_v28 = vmul.f32 %v778_v0, %v522_v17  ;;  %v907_v20 = vmul.f32 %v779_v11, %v523_v18  ;;  %v654_v0 = vld [vmem:[#allocation2 + $0x270] sm:$0xff] }
  0xbf   :  { %v904_v29 = vmul.f32 %v776_v12, %v520_v19  ;;  %v905_v30 = vmul.f32 %v777_v13, %v521_v21  ;;  %1338 = vmatpush1.bf16.xpose.msra.mxu1 %v1170_v8  ;;  %v155_v32 = vpop.permute.xlu1 %154  ;;  %v150_v35 = vpop.permute.xlu0 %149  ;;  %v1140_v63 = vpack.c.bf16 %v970_v22, %v968_v23  ;;  %v652_v12 = vld [vmem:[#allocation2 + $0x260] sm:$0xff]  ;;  %v653_v13 = vld [vmem:[#allocation2 + $0x268] sm:$0xff]  ;;  %v722_v14 = vld [vmem:[#allocation5 + $0x90] sm:$0xff] }
  0xc0   :  { %v462_v36 = vmul.f32 %v1880_v6, %v155_v32  ;;  %v463_v37 = vmul.f32 %v1884_v7, %v155_v32  ;;  %v460_v38 = vmul.f32 %v1880_v6, %v150_v35  ;;  %v461_v39 = vmul.f32 %v1884_v7, %v150_v35  ;;  %1226 = vmatprep.subr.bf16.mxu0 %v1141_v27  ;;  %v723_v21 = vld [vmem:[#allocation5 + $0x98] sm:$0xff]  ;;  %v720_v23 = vld [vmem:[#allocation5 + $0x80] sm:$0xff] }
  0xc1   :  { %v1034_v40 = vadd.f32 %v906_v28, %v650_v15  ;;  %v1035_v41 = vadd.f32 %v907_v20, %v651_v16  ;;  %v1032_v42 = vadd.f32 %v904_v29, %v648_v24  ;;  %v1033_v43 = vadd.f32 %v905_v30, %v649_v25  ;;  %v721_v24 = vld [vmem:[#allocation5 + $0x88] sm:$0xff] }
  0xc2   :  { %v846_v46 = vmul.f32 %v718_v26, %v462_v36  ;;  %v847_v47 = vmul.f32 %v719_v31, %v463_v37  ;;  %v844_v48 = vmul.f32 %v716_v33, %v460_v38  ;;  %v845_v49 = vmul.f32 %v717_v34, %v461_v39  ;;  %v595_v33 = vld [vmem:[#allocation2 + $0x98] sm:$0xff]  ;;  %v593_v34 = vld [vmem:[#allocation2 + $0x88] sm:$0xff]  ;;  %v594_v39 = vld [vmem:[#allocation2 + $0x90] sm:$0xff] }
  0xc3   :  { %v315_v53 = vpop.permute.xlu1 %314  ;;  %v310_v54 = vpop.permute.xlu0 %309  ;;  %v1173_v55 = vpack.c.bf16 %v1035_v41, %v1033_v43  ;;  %v1172_v56 = vpack.c.bf16 %v1034_v40, %v1032_v42  ;;  %v592_v40 = vld [vmem:[#allocation2 + $0x80] sm:$0xff]  ;;  %v786_v41 = vld [vmem:[#allocation5 + $0x290] sm:$0xff] }
  0xc4   :  { %v975_v57 = vadd.f32 %v847_v47, %v591_v44  ;;  %v973_v58 = vadd.f32 %v845_v49, %v589_v45  ;;  %v526_v4 = vmul.f32 %v1880_v6, %v315_v53  ;;  %v527_v5 = vmul.f32 %v1884_v7, %v315_v53  ;;  %v784_v49 = vld [vmem:[#allocation5 + $0x280] sm:$0xff]  ;;  %v659_v53 = vld [vmem:[#allocation2 + $0x298] sm:$0xff] }
  0xc5   :  { %v524_v8 = vmul.f32 %v1880_v6, %v310_v54  ;;  %v525_v9 = vmul.f32 %v1884_v7, %v310_v54  ;;  %1339 = vmatprep.subr.bf16.mxu1 %v1173_v55  ;;  %v974_v10 = vadd.f32 %v846_v46, %v590_v50  ;;  %v972_v11 = vadd.f32 %v844_v48, %v588_v51  ;;  %v787_v48 = vld [vmem:[#allocation5 + $0x298] sm:$0xff]  ;;  %v785_v50 = vld [vmem:[#allocation5 + $0x288] sm:$0xff] }
  0xc6   :  { %1227 = vmatpush1.bf16.xpose.msra.mxu0 %v1140_v63  ;;  %v1143_v15 = vpack.c.bf16 %v975_v57, %v973_v58  ;;  %v910_v16 = vmul.f32 %v782_v52, %v526_v4  ;;  %v911_v17 = vmul.f32 %v783_v59, %v527_v5  ;;  %v658_v52 = vld [vmem:[#allocation2 + $0x290] sm:$0xff] }
  0xc7   :  { %v908_v18 = vmul.f32 %v780_v60, %v524_v8  ;;  %v909_v19 = vmul.f32 %v781_v61, %v525_v9  ;;  %1340 = vmatpush1.bf16.xpose.msra.mxu1 %v1172_v56  ;;  %v165_v22 = vpop.permute.xlu1 %164  ;;  %v160_v25 = vpop.permute.xlu0 %159  ;;  %v1142_v51 = vpack.c.bf16 %v974_v10, %v972_v11  ;;  %v656_v60 = vld [vmem:[#allocation2 + $0x280] sm:$0xff]  ;;  %v657_v61 = vld [vmem:[#allocation2 + $0x288] sm:$0xff]  ;;  %v726_v63 = vld [vmem:[#allocation5 + $0xb0] sm:$0xff] }
  0xc8   :  { %v466_v26 = vmul.f32 %v1880_v6, %v165_v22  ;;  %v467_v27 = vmul.f32 %v1884_v7, %v165_v22  ;;  %v464_v28 = vmul.f32 %v1880_v6, %v160_v25  ;;  %v465_v20 = vmul.f32 %v1884_v7, %v160_v25  ;;  %1228 = vmatprep.subr.bf16.mxu0 %v1143_v15  ;;  %v727_v9 = vld [vmem:[#allocation5 + $0xb8] sm:$0xff]  ;;  %v724_v11 = vld [vmem:[#allocation5 + $0xa0] sm:$0xff] }
  0xc9   :  { %v1038_v29 = vadd.f32 %v910_v16, %v654_v0  ;;  %v1039_v30 = vadd.f32 %v911_v17, %v655_v3  ;;  %v1036_v31 = vadd.f32 %v908_v18, %v652_v12  ;;  %v1037_v32 = vadd.f32 %v909_v19, %v653_v13  ;;  %v725_v12 = vld [vmem:[#allocation5 + $0xa8] sm:$0xff] }
  0xca   :  { %v850_v35 = vmul.f32 %v722_v14, %v466_v26  ;;  %v851_v36 = vmul.f32 %v723_v21, %v467_v27  ;;  %v848_v37 = vmul.f32 %v720_v23, %v464_v28  ;;  %v849_v38 = vmul.f32 %v721_v24, %v465_v20  ;;  %v599_v23 = vld [vmem:[#allocation2 + $0xb8] sm:$0xff]  ;;  %v597_v24 = vld [vmem:[#allocation2 + $0xa8] sm:$0xff]  ;;  %v598_v20 = vld [vmem:[#allocation2 + $0xb0] sm:$0xff] }
  0xcb   :  { %v325_v42 = vpop.permute.xlu1 %324  ;;  %v320_v43 = vpop.permute.xlu0 %319  ;;  %v1175_v44 = vpack.c.bf16 %v1039_v30, %v1037_v32  ;;  %v1174_v45 = vpack.c.bf16 %v1038_v29, %v1036_v31  ;;  %v596_v29 = vld [vmem:[#allocation2 + $0xa0] sm:$0xff]  ;;  %v790_v30 = vld [vmem:[#allocation5 + $0x2b0] sm:$0xff] }
  0xcc   :  { %v979_v46 = vadd.f32 %v851_v36, %v595_v33  ;;  %v977_v47 = vadd.f32 %v849_v38, %v593_v34  ;;  %v530_v54 = vmul.f32 %v1880_v6, %v325_v42  ;;  %v531_v55 = vmul.f32 %v1884_v7, %v325_v42  ;;  %v788_v38 = vld [vmem:[#allocation5 + $0x2a0] sm:$0xff]  ;;  %v663_v42 = vld [vmem:[#allocation2 + $0x2b8] sm:$0xff] }
  0xcd   :  { %v528_v56 = vmul.f32 %v1880_v6, %v320_v43  ;;  %v529_v57 = vmul.f32 %v1884_v7, %v320_v43  ;;  %1341 = vmatprep.subr.bf16.mxu1 %v1175_v44  ;;  %v978_v58 = vadd.f32 %v850_v35, %v594_v39  ;;  %v976_v59 = vadd.f32 %v848_v37, %v592_v40  ;;  %v791_v37 = vld [vmem:[#allocation5 + $0x2b8] sm:$0xff]  ;;  %v789_v39 = vld [vmem:[#allocation5 + $0x2a8] sm:$0xff] }
  0xce   :  { %1229 = vmatpush1.bf16.xpose.msra.mxu0 %v1142_v51  ;;  %v1145_v0 = vpack.c.bf16 %v979_v46, %v977_v47  ;;  %v914_v3 = vmul.f32 %v786_v41, %v530_v54  ;;  %v915_v4 = vmul.f32 %v787_v48, %v531_v55  ;;  %v662_v41 = vld [vmem:[#allocation2 + $0x2b0] sm:$0xff] }
  0xcf   :  { %v912_v5 = vmul.f32 %v784_v49, %v528_v56  ;;  %v913_v8 = vmul.f32 %v785_v50, %v529_v57  ;;  %1342 = vmatpush1.bf16.xpose.msra.mxu1 %v1174_v45  ;;  %v175_v10 = vpop.permute.xlu1 %174  ;;  %v170_v13 = vpop.permute.xlu0 %169  ;;  %v1144_v40 = vpack.c.bf16 %v978_v58, %v976_v59  ;;  %v660_v49 = vld [vmem:[#allocation2 + $0x2a0] sm:$0xff]  ;;  %v661_v50 = vld [vmem:[#allocation2 + $0x2a8] sm:$0xff]  ;;  %v730_v51 = vld [vmem:[#allocation5 + $0xd0] sm:$0xff] }
  0xd0   :  { %v470_v14 = vmul.f32 %v1880_v6, %v175_v10  ;;  %v471_v15 = vmul.f32 %v1884_v7, %v175_v10  ;;  %v468_v16 = vmul.f32 %v1880_v6, %v170_v13  ;;  %v469_v17 = vmul.f32 %v1884_v7, %v170_v13  ;;  %1230 = vmatprep.subr.bf16.mxu0 %v1145_v0  ;;  %v731_v57 = vld [vmem:[#allocation5 + $0xd8] sm:$0xff]  ;;  %v728_v59 = vld [vmem:[#allocation5 + $0xc0] sm:$0xff] }
  0xd1   :  { %v1042_v18 = vadd.f32 %v914_v3, %v658_v52  ;;  %v1043_v19 = vadd.f32 %v915_v4, %v659_v53  ;;  %v1040_v21 = vadd.f32 %v912_v5, %v656_v60  ;;  %v1041_v22 = vadd.f32 %v913_v8, %v657_v61  ;;  %v729_v60 = vld [vmem:[#allocation5 + $0xc8] sm:$0xff] }
  0xd2   :  { %v854_v25 = vmul.f32 %v726_v63, %v470_v14  ;;  %v855_v26 = vmul.f32 %v727_v9, %v471_v15  ;;  %v852_v27 = vmul.f32 %v724_v11, %v468_v16  ;;  %v853_v28 = vmul.f32 %v725_v12, %v469_v17  ;;  %v603_v11 = vld [vmem:[#allocation2 + $0xd8] sm:$0xff]  ;;  %v601_v12 = vld [vmem:[#allocation2 + $0xc8] sm:$0xff]  ;;  %v602_v17 = vld [vmem:[#allocation2 + $0xd0] sm:$0xff] }
  0xd3   :  { %v335_v31 = vpop.permute.xlu1 %334  ;;  %v330_v32 = vpop.permute.xlu0 %329  ;;  %v1177_v33 = vpack.c.bf16 %v1043_v19, %v1041_v22  ;;  %v1176_v34 = vpack.c.bf16 %v1042_v18, %v1040_v21  ;;  %v600_v18 = vld [vmem:[#allocation2 + $0xc0] sm:$0xff]  ;;  %v794_v19 = vld [vmem:[#allocation5 + $0x2d0] sm:$0xff] }
  0xd4   :  { %v983_v35 = vadd.f32 %v855_v26, %v599_v23  ;;  %v981_v36 = vadd.f32 %v853_v28, %v597_v24  ;;  %v534_v43 = vmul.f32 %v1880_v6, %v335_v31  ;;  %v535_v44 = vmul.f32 %v1884_v7, %v335_v31  ;;  %v792_v28 = vld [vmem:[#allocation5 + $0x2c0] sm:$0xff]  ;;  %v667_v31 = vld [vmem:[#allocation2 + $0x2d8] sm:$0xff] }
  0xd5   :  { %v532_v45 = vmul.f32 %v1880_v6, %v330_v32  ;;  %v533_v46 = vmul.f32 %v1884_v7, %v330_v32  ;;  %1343 = vmatprep.subr.bf16.mxu1 %v1177_v33  ;;  %v982_v47 = vadd.f32 %v854_v25, %v598_v20  ;;  %v980_v48 = vadd.f32 %v852_v27, %v596_v29  ;;  %v795_v27 = vld [vmem:[#allocation5 + $0x2d8] sm:$0xff]  ;;  %v793_v20 = vld [vmem:[#allocation5 + $0x2c8] sm:$0xff] }
  0xd6   :  { %1231 = vmatpush1.bf16.xpose.msra.mxu0 %v1144_v40  ;;  %v1147_v52 = vpack.c.bf16 %v983_v35, %v981_v36  ;;  %v918_v53 = vmul.f32 %v790_v30, %v534_v43  ;;  %v919_v54 = vmul.f32 %v791_v37, %v535_v44  ;;  %v666_v30 = vld [vmem:[#allocation2 + $0x2d0] sm:$0xff] }
  0xd7   :  { %v916_v55 = vmul.f32 %v788_v38, %v532_v45  ;;  %v917_v56 = vmul.f32 %v789_v39, %v533_v46  ;;  %1344 = vmatpush1.bf16.xpose.msra.mxu1 %v1176_v34  ;;  %v185_v58 = vpop.permute.xlu1 %184  ;;  %v180_v61 = vpop.permute.xlu0 %179  ;;  %v1146_v29 = vpack.c.bf16 %v982_v47, %v980_v48  ;;  %v664_v38 = vld [vmem:[#allocation2 + $0x2c0] sm:$0xff]  ;;  %v665_v39 = vld [vmem:[#allocation2 + $0x2c8] sm:$0xff]  ;;  %v734_v40 = vld [vmem:[#allocation5 + $0xf0] sm:$0xff] }
  0xd8   :  { %v474_v63 = vmul.f32 %v1880_v6, %v185_v58  ;;  %v475_v0 = vmul.f32 %v1884_v7, %v185_v58  ;;  %v472_v3 = vmul.f32 %v1880_v6, %v180_v61  ;;  %v473_v4 = vmul.f32 %v1884_v7, %v180_v61  ;;  %1232 = vmatprep.subr.bf16.mxu0 %v1147_v52  ;;  %v735_v46 = vld [vmem:[#allocation5 + $0xf8] sm:$0xff]  ;;  %v732_v48 = vld [vmem:[#allocation5 + $0xe0] sm:$0xff] }
  0xd9   :  { %v1046_v5 = vadd.f32 %v918_v53, %v662_v41  ;;  %v1047_v8 = vadd.f32 %v919_v54, %v663_v42  ;;  %v1044_v9 = vadd.f32 %v916_v55, %v660_v49  ;;  %v1045_v10 = vadd.f32 %v917_v56, %v661_v50  ;;  %v733_v49 = vld [vmem:[#allocation5 + $0xe8] sm:$0xff] }
  0xda   :  { %v858_v13 = vmul.f32 %v730_v51, %v474_v63  ;;  %v859_v14 = vmul.f32 %v731_v57, %v475_v0  ;;  %v856_v15 = vmul.f32 %v728_v59, %v472_v3  ;;  %v857_v16 = vmul.f32 %v729_v60, %v473_v4  ;;  %v607_v59 = vld [vmem:[#allocation2 + $0xf8] sm:$0xff]  ;;  %v605_v60 = vld [vmem:[#allocation2 + $0xe8] sm:$0xff]  ;;  %v606_v4 = vld [vmem:[#allocation2 + $0xf0] sm:$0xff] }
  0xdb   :  { %v345_v21 = vpop.permute.xlu1 %344  ;;  %v340_v22 = vpop.permute.xlu0 %339  ;;  %v1179_v23 = vpack.c.bf16 %v1047_v8, %v1045_v10  ;;  %v1178_v24 = vpack.c.bf16 %v1046_v5, %v1044_v9  ;;  %v604_v5 = vld [vmem:[#allocation2 + $0xe0] sm:$0xff]  ;;  %v798_v8 = vld [vmem:[#allocation5 + $0x2f0] sm:$0xff] }
  0xdc   :  { %v987_v25 = vadd.f32 %v859_v14, %v603_v11  ;;  %v985_v26 = vadd.f32 %v857_v16, %v601_v12  ;;  %v538_v32 = vmul.f32 %v1880_v6, %v345_v21  ;;  %v539_v33 = vmul.f32 %v1884_v7, %v345_v21  ;;  %v796_v16 = vld [vmem:[#allocation5 + $0x2e0] sm:$0xff]  ;;  %v671_v21 = vld [vmem:[#allocation2 + $0x2f8] sm:$0xff] }
  0xdd   :  { %v536_v34 = vmul.f32 %v1880_v6, %v340_v22  ;;  %v537_v35 = vmul.f32 %v1884_v7, %v340_v22  ;;  %1345 = vmatprep.subr.bf16.mxu1 %v1179_v23  ;;  %v986_v36 = vadd.f32 %v858_v13, %v602_v17  ;;  %v984_v37 = vadd.f32 %v856_v15, %v600_v18  ;;  %v799_v15 = vld [vmem:[#allocation5 + $0x2f8] sm:$0xff]  ;;  %v797_v17 = vld [vmem:[#allocation5 + $0x2e8] sm:$0xff] }
  0xde   :  { %1233 = vmatpush1.bf16.xpose.msra.mxu0 %v1146_v29  ;;  %v1149_v41 = vpack.c.bf16 %v987_v25, %v985_v26  ;;  %v922_v42 = vmul.f32 %v794_v19, %v538_v32  ;;  %v923_v43 = vmul.f32 %v795_v27, %v539_v33  ;;  %v670_v19 = vld [vmem:[#allocation2 + $0x2f0] sm:$0xff] }
  0xdf   :  { %v920_v44 = vmul.f32 %v792_v28, %v536_v34  ;;  %v921_v45 = vmul.f32 %v793_v20, %v537_v35  ;;  %1346 = vmatpush1.bf16.xpose.msra.mxu1 %v1178_v24  ;;  %v195_v47 = vpop.permute.xlu1 %194  ;;  %v190_v50 = vpop.permute.xlu0 %189  ;;  %v1148_v18 = vpack.c.bf16 %v986_v36, %v984_v37  ;;  %v668_v28 = vld [vmem:[#allocation2 + $0x2e0] sm:$0xff]  ;;  %v669_v20 = vld [vmem:[#allocation2 + $0x2e8] sm:$0xff]  ;;  %v738_v29 = vld [vmem:[#allocation5 + $0x110] sm:$0xff] }
  0xe0   :  { %v478_v51 = vmul.f32 %v1880_v6, %v195_v47  ;;  %v479_v52 = vmul.f32 %v1884_v7, %v195_v47  ;;  %v476_v53 = vmul.f32 %v1880_v6, %v190_v50  ;;  %v477_v54 = vmul.f32 %v1884_v7, %v190_v50  ;;  %1234 = vmatprep.subr.bf16.mxu0 %v1149_v41  ;;  %v739_v35 = vld [vmem:[#allocation5 + $0x118] sm:$0xff]  ;;  %v736_v37 = vld [vmem:[#allocation5 + $0x100] sm:$0xff] }
  0xe1   :  { %v1050_v55 = vadd.f32 %v922_v42, %v666_v30  ;;  %v1051_v56 = vadd.f32 %v923_v43, %v667_v31  ;;  %v1048_v57 = vadd.f32 %v920_v44, %v664_v38  ;;  %v1049_v58 = vadd.f32 %v921_v45, %v665_v39  ;;  %v737_v38 = vld [vmem:[#allocation5 + $0x108] sm:$0xff] }
  0xe2   :  { %v862_v61 = vmul.f32 %v734_v40, %v478_v51  ;;  %v863_v63 = vmul.f32 %v735_v46, %v479_v52  ;;  %v860_v0 = vmul.f32 %v732_v48, %v476_v53  ;;  %v861_v3 = vmul.f32 %v733_v49, %v477_v54  ;;  %v611_v48 = vld [vmem:[#allocation2 + $0x118] sm:$0xff]  ;;  %v609_v49 = vld [vmem:[#allocation2 + $0x108] sm:$0xff]  ;;  %v610_v54 = vld [vmem:[#allocation2 + $0x110] sm:$0xff] }
  0xe3   :  { %v355_v9 = vpop.permute.xlu1 %354  ;;  %v350_v10 = vpop.permute.xlu0 %349  ;;  %v1181_v11 = vpack.c.bf16 %v1051_v56, %v1049_v58  ;;  %v1180_v12 = vpack.c.bf16 %v1050_v55, %v1048_v57  ;;  %v608_v55 = vld [vmem:[#allocation2 + $0x100] sm:$0xff]  ;;  %v802_v56 = vld [vmem:[#allocation5 + $0x310] sm:$0xff] }
  0xe4   :  { %v991_v13 = vadd.f32 %v863_v63, %v607_v59  ;;  %v989_v14 = vadd.f32 %v861_v3, %v605_v60  ;;  %v542_v22 = vmul.f32 %v1880_v6, %v355_v9  ;;  %v543_v23 = vmul.f32 %v1884_v7, %v355_v9  ;;  %v800_v3 = vld [vmem:[#allocation5 + $0x300] sm:$0xff]  ;;  %v675_v9 = vld [vmem:[#allocation2 + $0x318] sm:$0xff] }
  0xe5   :  { %v540_v24 = vmul.f32 %v1880_v6, %v350_v10  ;;  %v541_v25 = vmul.f32 %v1884_v7, %v350_v10  ;;  %1347 = vmatprep.subr.bf16.mxu1 %v1181_v11  ;;  %v990_v26 = vadd.f32 %v862_v61, %v606_v4  ;;  %v988_v27 = vadd.f32 %v860_v0, %v604_v5  ;;  %v803_v0 = vld [vmem:[#allocation5 + $0x318] sm:$0xff]  ;;  %v801_v4 = vld [vmem:[#allocation5 + $0x308] sm:$0xff] }
  0xe6   :  { %1235 = vmatpush1.bf16.xpose.msra.mxu0 %v1148_v18  ;;  %v1151_v30 = vpack.c.bf16 %v991_v13, %v989_v14  ;;  %v926_v31 = vmul.f32 %v798_v8, %v542_v22  ;;  %v927_v32 = vmul.f32 %v799_v15, %v543_v23  ;;  %v674_v8 = vld [vmem:[#allocation2 + $0x310] sm:$0xff] }
  0xe7   :  { %v924_v33 = vmul.f32 %v796_v16, %v540_v24  ;;  %v925_v34 = vmul.f32 %v797_v17, %v541_v25  ;;  %1348 = vmatpush1.bf16.xpose.msra.mxu1 %v1180_v12  ;;  %v205_v36 = vpop.permute.xlu1 %204  ;;  %v200_v39 = vpop.permute.xlu0 %199  ;;  %v1150_v5 = vpack.c.bf16 %v990_v26, %v988_v27  ;;  %v672_v16 = vld [vmem:[#allocation2 + $0x300] sm:$0xff]  ;;  %v673_v17 = vld [vmem:[#allocation2 + $0x308] sm:$0xff]  ;;  %v742_v18 = vld [vmem:[#allocation5 + $0x130] sm:$0xff] }
  0xe8   :  { %v482_v40 = vmul.f32 %v1880_v6, %v205_v36  ;;  %v483_v41 = vmul.f32 %v1884_v7, %v205_v36  ;;  %v480_v42 = vmul.f32 %v1880_v6, %v200_v39  ;;  %v481_v43 = vmul.f32 %v1884_v7, %v200_v39  ;;  %1236 = vmatprep.subr.bf16.mxu0 %v1151_v30  ;;  %v743_v25 = vld [vmem:[#allocation5 + $0x138] sm:$0xff]  ;;  %v740_v27 = vld [vmem:[#allocation5 + $0x120] sm:$0xff] }
  0xe9   :  { %v1054_v44 = vadd.f32 %v926_v31, %v670_v19  ;;  %v1055_v45 = vadd.f32 %v927_v32, %v671_v21  ;;  %v1052_v46 = vadd.f32 %v924_v33, %v668_v28  ;;  %v1053_v47 = vadd.f32 %v925_v34, %v669_v20  ;;  %v741_v28 = vld [vmem:[#allocation5 + $0x128] sm:$0xff] }
  0xea   :  { %v866_v50 = vmul.f32 %v738_v29, %v482_v40  ;;  %v867_v51 = vmul.f32 %v739_v35, %v483_v41  ;;  %v864_v52 = vmul.f32 %v736_v37, %v480_v42  ;;  %v865_v53 = vmul.f32 %v737_v38, %v481_v43  ;;  %v615_v37 = vld [vmem:[#allocation2 + $0x138] sm:$0xff]  ;;  %v613_v38 = vld [vmem:[#allocation2 + $0x128] sm:$0xff]  ;;  %v614_v43 = vld [vmem:[#allocation2 + $0x130] sm:$0xff] }
  0xeb   :  { %v365_v57 = vpop.permute.xlu1 %364  ;;  %v360_v58 = vpop.permute.xlu0 %359  ;;  %v1183_v59 = vpack.c.bf16 %v1055_v45, %v1053_v47  ;;  %v1182_v60 = vpack.c.bf16 %v1054_v44, %v1052_v46  ;;  %v612_v44 = vld [vmem:[#allocation2 + $0x120] sm:$0xff]  ;;  %v806_v45 = vld [vmem:[#allocation5 + $0x330] sm:$0xff] }
  0xec   :  { %v995_v61 = vadd.f32 %v867_v51, %v611_v48  ;;  %v993_v63 = vadd.f32 %v865_v53, %v609_v49  ;;  %v546_v10 = vmul.f32 %v1880_v6, %v365_v57  ;;  %v547_v11 = vmul.f32 %v1884_v7, %v365_v57  ;;  %v804_v53 = vld [vmem:[#allocation5 + $0x320] sm:$0xff]  ;;  %v679_v57 = vld [vmem:[#allocation2 + $0x338] sm:$0xff] }
  0xed   :  { %v544_v12 = vmul.f32 %v1880_v6, %v360_v58  ;;  %v545_v13 = vmul.f32 %v1884_v7, %v360_v58  ;;  %1349 = vmatprep.subr.bf16.mxu1 %v1183_v59  ;;  %v994_v14 = vadd.f32 %v866_v50, %v610_v54  ;;  %v992_v15 = vadd.f32 %v864_v52, %v608_v55  ;;  %v807_v52 = vld [vmem:[#allocation5 + $0x338] sm:$0xff]  ;;  %v805_v54 = vld [vmem:[#allocation5 + $0x328] sm:$0xff] }
  0xee   :  { %1237 = vmatpush1.bf16.xpose.msra.mxu0 %v1150_v5  ;;  %v1153_v19 = vpack.c.bf16 %v995_v61, %v993_v63  ;;  %v930_v21 = vmul.f32 %v802_v56, %v546_v10  ;;  %v931_v22 = vmul.f32 %v803_v0, %v547_v11  ;;  %v678_v56 = vld [vmem:[#allocation2 + $0x330] sm:$0xff] }
  0xef   :  { %v928_v23 = vmul.f32 %v800_v3, %v544_v12  ;;  %v929_v24 = vmul.f32 %v801_v4, %v545_v13  ;;  %1350 = vmatpush1.bf16.xpose.msra.mxu1 %v1182_v60  ;;  %v215_v26 = vpop.permute.xlu1 %214  ;;  %v210_v20 = vpop.permute.xlu0 %209  ;;  %v1152_v55 = vpack.c.bf16 %v994_v14, %v992_v15  ;;  %v676_v3 = vld [vmem:[#allocation2 + $0x320] sm:$0xff]  ;;  %v677_v4 = vld [vmem:[#allocation2 + $0x328] sm:$0xff]  ;;  %v746_v5 = vld [vmem:[#allocation5 + $0x150] sm:$0xff] }
  0xf0   :  { %v486_v29 = vmul.f32 %v1880_v6, %v215_v26  ;;  %v487_v30 = vmul.f32 %v1884_v7, %v215_v26  ;;  %v484_v31 = vmul.f32 %v1880_v6, %v210_v20  ;;  %v485_v32 = vmul.f32 %v1884_v7, %v210_v20  ;;  %1238 = vmatprep.subr.bf16.mxu0 %v1153_v19  ;;  %v747_v13 = vld [vmem:[#allocation5 + $0x158] sm:$0xff]  ;;  %v744_v15 = vld [vmem:[#allocation5 + $0x140] sm:$0xff] }
  0xf1   :  { %v1058_v33 = vadd.f32 %v930_v21, %v674_v8  ;;  %v1059_v34 = vadd.f32 %v931_v22, %v675_v9  ;;  %v1056_v35 = vadd.f32 %v928_v23, %v672_v16  ;;  %v1057_v36 = vadd.f32 %v929_v24, %v673_v17  ;;  %v745_v16 = vld [vmem:[#allocation5 + $0x148] sm:$0xff] }
  0xf2   :  { %v870_v39 = vmul.f32 %v742_v18, %v486_v29  ;;  %v871_v40 = vmul.f32 %v743_v25, %v487_v30  ;;  %v868_v41 = vmul.f32 %v740_v27, %v484_v31  ;;  %v869_v42 = vmul.f32 %v741_v28, %v485_v32  ;;  %v619_v27 = vld [vmem:[#allocation2 + $0x158] sm:$0xff]  ;;  %v617_v28 = vld [vmem:[#allocation2 + $0x148] sm:$0xff]  ;;  %v618_v32 = vld [vmem:[#allocation2 + $0x150] sm:$0xff] }
  0xf3   :  { %v375_v46 = vpop.permute.xlu1 %374  ;;  %v370_v47 = vpop.permute.xlu0 %369  ;;  %v1185_v48 = vpack.c.bf16 %v1059_v34, %v1057_v36  ;;  %v1184_v49 = vpack.c.bf16 %v1058_v33, %v1056_v35  ;;  %v616_v33 = vld [vmem:[#allocation2 + $0x140] sm:$0xff]  ;;  %v810_v34 = vld [vmem:[#allocation5 + $0x350] sm:$0xff] }
  0xf4   :  { %v999_v50 = vadd.f32 %v871_v40, %v615_v37  ;;  %v997_v51 = vadd.f32 %v869_v42, %v613_v38  ;;  %v550_v58 = vmul.f32 %v1880_v6, %v375_v46  ;;  %v551_v59 = vmul.f32 %v1884_v7, %v375_v46  ;;  %v808_v42 = vld [vmem:[#allocation5 + $0x340] sm:$0xff]  ;;  %v683_v46 = vld [vmem:[#allocation2 + $0x358] sm:$0xff] }
  0xf5   :  { %v548_v60 = vmul.f32 %v1880_v6, %v370_v47  ;;  %v549_v61 = vmul.f32 %v1884_v7, %v370_v47  ;;  %1351 = vmatprep.subr.bf16.mxu1 %v1185_v48  ;;  %v998_v63 = vadd.f32 %v870_v39, %v614_v43  ;;  %v996_v0 = vadd.f32 %v868_v41, %v612_v44  ;;  %v811_v41 = vld [vmem:[#allocation5 + $0x358] sm:$0xff]  ;;  %v809_v43 = vld [vmem:[#allocation5 + $0x348] sm:$0xff] }
  0xf6   :  { %1239 = vmatpush1.bf16.xpose.msra.mxu0 %v1152_v55  ;;  %v1155_v8 = vpack.c.bf16 %v999_v50, %v997_v51  ;;  %v934_v9 = vmul.f32 %v806_v45, %v550_v58  ;;  %v935_v10 = vmul.f32 %v807_v52, %v551_v59  ;;  %v682_v45 = vld [vmem:[#allocation2 + $0x350] sm:$0xff] }
  0xf7   :  { %v932_v11 = vmul.f32 %v804_v53, %v548_v60  ;;  %v933_v12 = vmul.f32 %v805_v54, %v549_v61  ;;  %1352 = vmatpush1.bf16.xpose.msra.mxu1 %v1184_v49  ;;  %v225_v14 = vpop.permute.xlu1 %224  ;;  %v220_v17 = vpop.permute.xlu0 %219  ;;  %v1154_v44 = vpack.c.bf16 %v998_v63, %v996_v0  ;;  %v680_v53 = vld [vmem:[#allocation2 + $0x340] sm:$0xff]  ;;  %v681_v54 = vld [vmem:[#allocation2 + $0x348] sm:$0xff]  ;;  %v750_v55 = vld [vmem:[#allocation5 + $0x170] sm:$0xff] }
  0xf8   :  { %v490_v18 = vmul.f32 %v1880_v6, %v225_v14  ;;  %v491_v19 = vmul.f32 %v1884_v7, %v225_v14  ;;  %v488_v21 = vmul.f32 %v1880_v6, %v220_v17  ;;  %v489_v22 = vmul.f32 %v1884_v7, %v220_v17  ;;  %1240 = vmatprep.subr.bf16.mxu0 %v1155_v8  ;;  %v751_v61 = vld [vmem:[#allocation5 + $0x178] sm:$0xff]  ;;  %v748_v0 = vld [vmem:[#allocation5 + $0x160] sm:$0xff] }
  0xf9   :  { %v1062_v23 = vadd.f32 %v934_v9, %v678_v56  ;;  %v1063_v24 = vadd.f32 %v935_v10, %v679_v57  ;;  %v1060_v25 = vadd.f32 %v932_v11, %v676_v3  ;;  %v1061_v26 = vadd.f32 %v933_v12, %v677_v4  ;;  %v749_v3 = vld [vmem:[#allocation5 + $0x168] sm:$0xff] }
  0xfa   :  { %v874_v20 = vmul.f32 %v746_v5, %v490_v18  ;;  %v875_v29 = vmul.f32 %v747_v13, %v491_v19  ;;  %v872_v30 = vmul.f32 %v744_v15, %v488_v21  ;;  %v873_v31 = vmul.f32 %v745_v16, %v489_v22  ;;  %v623_v15 = vld [vmem:[#allocation2 + $0x178] sm:$0xff]  ;;  %v621_v16 = vld [vmem:[#allocation2 + $0x168] sm:$0xff]  ;;  %v622_v22 = vld [vmem:[#allocation2 + $0x170] sm:$0xff] }
  0xfb   :  { %v385_v35 = vpop.permute.xlu1 %384  ;;  %v380_v36 = vpop.permute.xlu0 %379  ;;  %v1187_v37 = vpack.c.bf16 %v1063_v24, %v1061_v26  ;;  %v1186_v38 = vpack.c.bf16 %v1062_v23, %v1060_v25  ;;  %v620_v23 = vld [vmem:[#allocation2 + $0x160] sm:$0xff]  ;;  %v814_v24 = vld [vmem:[#allocation5 + $0x370] sm:$0xff] }
  0xfc   :  { %v1003_v39 = vadd.f32 %v875_v29, %v619_v27  ;;  %v1001_v40 = vadd.f32 %v873_v31, %v617_v28  ;;  %v554_v47 = vmul.f32 %v1880_v6, %v385_v35  ;;  %v555_v48 = vmul.f32 %v1884_v7, %v385_v35  ;;  %v812_v31 = vld [vmem:[#allocation5 + $0x360] sm:$0xff]  ;;  %v687_v35 = vld [vmem:[#allocation2 + $0x378] sm:$0xff] }
  0xfd   :  { %v552_v49 = vmul.f32 %v1880_v6, %v380_v36  ;;  %v553_v50 = vmul.f32 %v1884_v7, %v380_v36  ;;  %1353 = vmatprep.subr.bf16.mxu1 %v1187_v37  ;;  %v1002_v51 = vadd.f32 %v874_v20, %v618_v32  ;;  %v1000_v52 = vadd.f32 %v872_v30, %v616_v33  ;;  %v815_v30 = vld [vmem:[#allocation5 + $0x378] sm:$0xff]  ;;  %v813_v32 = vld [vmem:[#allocation5 + $0x368] sm:$0xff] }
  0xfe   :  { %1241 = vmatpush1.bf16.xpose.msra.mxu0 %v1154_v44  ;;  %v1157_v56 = vpack.c.bf16 %v1003_v39, %v1001_v40  ;;  %v938_v57 = vmul.f32 %v810_v34, %v554_v47  ;;  %v939_v58 = vmul.f32 %v811_v41, %v555_v48  ;;  %v686_v34 = vld [vmem:[#allocation2 + $0x370] sm:$0xff] }
  0xff   :  { %v936_v59 = vmul.f32 %v808_v42, %v552_v49  ;;  %v937_v60 = vmul.f32 %v809_v43, %v553_v50  ;;  %1354 = vmatpush1.bf16.xpose.msra.mxu1 %v1186_v38  ;;  %v235_v63 = vpop.permute.xlu1 %234  ;;  %v230_v4 = vpop.permute.xlu0 %229  ;;  %v1156_v33 = vpack.c.bf16 %v1002_v51, %v1000_v52  ;;  %v684_v42 = vld [vmem:[#allocation2 + $0x360] sm:$0xff]  ;;  %v685_v43 = vld [vmem:[#allocation2 + $0x368] sm:$0xff]  ;;  %v754_v44 = vld [vmem:[#allocation5 + $0x190] sm:$0xff] }
 0x100   :  { %v494_v5 = vmul.f32 %v1880_v6, %v235_v63  ;;  %v495_v8 = vmul.f32 %v1884_v7, %v235_v63  ;;  %v492_v9 = vmul.f32 %v1880_v6, %v230_v4  ;;  %v493_v10 = vmul.f32 %v1884_v7, %v230_v4  ;;  %1242 = vmatprep.subr.bf16.mxu0 %v1157_v56  ;;  %v755_v50 = vld [vmem:[#allocation5 + $0x198] sm:$0xff]  ;;  %v752_v52 = vld [vmem:[#allocation5 + $0x180] sm:$0xff] }
 0x101   :  { %v1066_v11 = vadd.f32 %v938_v57, %v682_v45  ;;  %v1067_v12 = vadd.f32 %v939_v58, %v683_v46  ;;  %v1064_v13 = vadd.f32 %v936_v59, %v680_v53  ;;  %v1065_v14 = vadd.f32 %v937_v60, %v681_v54  ;;  %v753_v53 = vld [vmem:[#allocation5 + $0x188] sm:$0xff] }
 0x102   :  { %v878_v17 = vmul.f32 %v750_v55, %v494_v5  ;;  %v879_v18 = vmul.f32 %v751_v61, %v495_v8  ;;  %v876_v19 = vmul.f32 %v748_v0, %v492_v9  ;;  %v877_v21 = vmul.f32 %v749_v3, %v493_v10  ;;  %v627_v0 = vld [vmem:[#allocation2 + $0x198] sm:$0xff]  ;;  %v625_v3 = vld [vmem:[#allocation2 + $0x188] sm:$0xff]  ;;  %v626_v10 = vld [vmem:[#allocation2 + $0x190] sm:$0xff] }
 0x103   :  { %v395_v25 = vpop.permute.xlu1 %394  ;;  %v390_v26 = vpop.permute.xlu0 %389  ;;  %v1189_v27 = vpack.c.bf16 %v1067_v12, %v1065_v14  ;;  %v1188_v28 = vpack.c.bf16 %v1066_v11, %v1064_v13  ;;  %v624_v11 = vld [vmem:[#allocation2 + $0x180] sm:$0xff]  ;;  %v818_v12 = vld [vmem:[#allocation5 + $0x390] sm:$0xff] }
 0x104   :  { %v1007_v20 = vadd.f32 %v879_v18, %v623_v15  ;;  %v1005_v29 = vadd.f32 %v877_v21, %v621_v16  ;;  %v558_v36 = vmul.f32 %v1880_v6, %v395_v25  ;;  %v559_v37 = vmul.f32 %v1884_v7, %v395_v25  ;;  %v816_v21 = vld [vmem:[#allocation5 + $0x380] sm:$0xff]  ;;  %v691_v25 = vld [vmem:[#allocation2 + $0x398] sm:$0xff] }
 0x105   :  { %v556_v38 = vmul.f32 %v1880_v6, %v390_v26  ;;  %v557_v39 = vmul.f32 %v1884_v7, %v390_v26  ;;  %1355 = vmatprep.subr.bf16.mxu1 %v1189_v27  ;;  %v1006_v40 = vadd.f32 %v878_v17, %v622_v22  ;;  %v1004_v41 = vadd.f32 %v876_v19, %v620_v23  ;;  %v819_v19 = vld [vmem:[#allocation5 + $0x398] sm:$0xff]  ;;  %v817_v22 = vld [vmem:[#allocation5 + $0x388] sm:$0xff] }
 0x106   :  { %1243 = vmatpush1.bf16.xpose.msra.mxu0 %v1156_v33  ;;  %v1159_v45 = vpack.c.bf16 %v1007_v20, %v1005_v29  ;;  %v942_v46 = vmul.f32 %v814_v24, %v558_v36  ;;  %v943_v47 = vmul.f32 %v815_v30, %v559_v37  ;;  %v690_v24 = vld [vmem:[#allocation2 + $0x390] sm:$0xff] }
 0x107   :  { %v940_v48 = vmul.f32 %v812_v31, %v556_v38  ;;  %v941_v49 = vmul.f32 %v813_v32, %v557_v39  ;;  %1356 = vmatpush1.bf16.xpose.msra.mxu1 %v1188_v28  ;;  %v245_v51 = vpop.permute.xlu1 %244  ;;  %v240_v54 = vpop.permute.xlu0 %239  ;;  %v1158_v23 = vpack.c.bf16 %v1006_v40, %v1004_v41  ;;  %v688_v31 = vld [vmem:[#allocation2 + $0x380] sm:$0xff]  ;;  %v689_v32 = vld [vmem:[#allocation2 + $0x388] sm:$0xff]  ;;  %v758_v33 = vld [vmem:[#allocation5 + $0x1b0] sm:$0xff] }
 0x108   :  { %v498_v55 = vmul.f32 %v1880_v6, %v245_v51  ;;  %v499_v56 = vmul.f32 %v1884_v7, %v245_v51  ;;  %v496_v57 = vmul.f32 %v1880_v6, %v240_v54  ;;  %v497_v58 = vmul.f32 %v1884_v7, %v240_v54  ;;  %1244 = vmatprep.subr.bf16.mxu0 %v1159_v45  ;;  %v759_v39 = vld [vmem:[#allocation5 + $0x1b8] sm:$0xff]  ;;  %v756_v41 = vld [vmem:[#allocation5 + $0x1a0] sm:$0xff] }
 0x109   :  { %v1070_v59 = vadd.f32 %v942_v46, %v686_v34  ;;  %v1071_v60 = vadd.f32 %v943_v47, %v687_v35  ;;  %v1068_v61 = vadd.f32 %v940_v48, %v684_v42  ;;  %v1069_v63 = vadd.f32 %v941_v49, %v685_v43  ;;  %v757_v42 = vld [vmem:[#allocation5 + $0x1a8] sm:$0xff] }
 0x10a   :  { %v882_v4 = vmul.f32 %v754_v44, %v498_v55  ;;  %v883_v5 = vmul.f32 %v755_v50, %v499_v56  ;;  %v880_v8 = vmul.f32 %v752_v52, %v496_v57  ;;  %v881_v9 = vmul.f32 %v753_v53, %v497_v58  ;;  %v631_v52 = vld [vmem:[#allocation2 + $0x1b8] sm:$0xff]  ;;  %v629_v53 = vld [vmem:[#allocation2 + $0x1a8] sm:$0xff]  ;;  %v630_v58 = vld [vmem:[#allocation2 + $0x1b0] sm:$0xff] }
 0x10b   :  { %v405_v13 = vpop.permute.xlu1 %404  ;;  %v400_v14 = vpop.permute.xlu0 %399  ;;  %v1191_v15 = vpack.c.bf16 %v1071_v60, %v1069_v63  ;;  %v1190_v16 = vpack.c.bf16 %v1070_v59, %v1068_v61  ;;  %v628_v59 = vld [vmem:[#allocation2 + $0x1a0] sm:$0xff]  ;;  %v822_v60 = vld [vmem:[#allocation5 + $0x3b0] sm:$0xff] }
 0x10c   :  { %v1011_v17 = vadd.f32 %v883_v5, %v627_v0  ;;  %v1009_v18 = vadd.f32 %v881_v9, %v625_v3  ;;  %v562_v26 = vmul.f32 %v1880_v6, %v405_v13  ;;  %v563_v27 = vmul.f32 %v1884_v7, %v405_v13  ;;  %v820_v9 = vld [vmem:[#allocation5 + $0x3a0] sm:$0xff]  ;;  %v695_v13 = vld [vmem:[#allocation2 + $0x3b8] sm:$0xff] }
 0x10d   :  { %v560_v28 = vmul.f32 %v1880_v6, %v400_v14  ;;  %v561_v20 = vmul.f32 %v1884_v7, %v400_v14  ;;  %1357 = vmatprep.subr.bf16.mxu1 %v1191_v15  ;;  %v1010_v29 = vadd.f32 %v882_v4, %v626_v10  ;;  %v1008_v30 = vadd.f32 %v880_v8, %v624_v11  ;;  %v823_v8 = vld [vmem:[#allocation5 + $0x3b8] sm:$0xff]  ;;  %v821_v10 = vld [vmem:[#allocation5 + $0x3a8] sm:$0xff] }
 0x10e   :  { %1245 = vmatpush1.bf16.xpose.msra.mxu0 %v1158_v23  ;;  %v1161_v34 = vpack.c.bf16 %v1011_v17, %v1009_v18  ;;  %v946_v35 = vmul.f32 %v818_v12, %v562_v26  ;;  %v947_v36 = vmul.f32 %v819_v19, %v563_v27  ;;  %v694_v12 = vld [vmem:[#allocation2 + $0x3b0] sm:$0xff] }
 0x10f   :  { %v944_v37 = vmul.f32 %v816_v21, %v560_v28  ;;  %v945_v38 = vmul.f32 %v817_v22, %v561_v20  ;;  %1358 = vmatpush1.bf16.xpose.msra.mxu1 %v1190_v16  ;;  %v255_v40 = vpop.permute.xlu1 %254  ;;  %v250_v43 = vpop.permute.xlu0 %249  ;;  %v1160_v11 = vpack.c.bf16 %v1010_v29, %v1008_v30  ;;  %v692_v21 = vld [vmem:[#allocation2 + $0x3a0] sm:$0xff]  ;;  %v693_v22 = vld [vmem:[#allocation2 + $0x3a8] sm:$0xff]  ;;  %v762_v23 = vld [vmem:[#allocation5 + $0x1d0] sm:$0xff] }
 0x110   :  { %v502_v44 = vmul.f32 %v1880_v6, %v255_v40  ;;  %v503_v45 = vmul.f32 %v1884_v7, %v255_v40  ;;  %v500_v46 = vmul.f32 %v1880_v6, %v250_v43  ;;  %v501_v47 = vmul.f32 %v1884_v7, %v250_v43  ;;  %1246 = vmatprep.subr.bf16.mxu0 %v1161_v34  ;;  %v763_v20 = vld [vmem:[#allocation5 + $0x1d8] sm:$0xff]  ;;  %v760_v30 = vld [vmem:[#allocation5 + $0x1c0] sm:$0xff] }
 0x111   :  { %v1074_v48 = vadd.f32 %v946_v35, %v690_v24  ;;  %v1075_v49 = vadd.f32 %v947_v36, %v691_v25  ;;  %v1072_v50 = vadd.f32 %v944_v37, %v688_v31  ;;  %v1073_v51 = vadd.f32 %v945_v38, %v689_v32  ;;  %v761_v31 = vld [vmem:[#allocation5 + $0x1c8] sm:$0xff] }
 0x112   :  { %v886_v54 = vmul.f32 %v758_v33, %v502_v44  ;;  %v887_v55 = vmul.f32 %v759_v39, %v503_v45  ;;  %v884_v56 = vmul.f32 %v756_v41, %v500_v46  ;;  %v885_v57 = vmul.f32 %v757_v42, %v501_v47  ;;  %v635_v41 = vld [vmem:[#allocation2 + $0x1d8] sm:$0xff]  ;;  %v633_v42 = vld [vmem:[#allocation2 + $0x1c8] sm:$0xff]  ;;  %v634_v47 = vld [vmem:[#allocation2 + $0x1d0] sm:$0xff] }
 0x113   :  { %v415_v61 = vpop.permute.xlu1 %414  ;;  %v410_v63 = vpop.permute.xlu0 %409  ;;  %v1193_v0 = vpack.c.bf16 %v1075_v49, %v1073_v51  ;;  %v1192_v3 = vpack.c.bf16 %v1074_v48, %v1072_v50  ;;  %v632_v48 = vld [vmem:[#allocation2 + $0x1c0] sm:$0xff]  ;;  %v826_v49 = vld [vmem:[#allocation5 + $0x3d0] sm:$0xff] }
 0x114   :  { %v1015_v4 = vadd.f32 %v887_v55, %v631_v52  ;;  %v1013_v5 = vadd.f32 %v885_v57, %v629_v53  ;;  %v566_v14 = vmul.f32 %v1880_v6, %v415_v61  ;;  %v567_v15 = vmul.f32 %v1884_v7, %v415_v61  ;;  %v824_v57 = vld [vmem:[#allocation5 + $0x3c0] sm:$0xff] }
 0x115   :  { %v564_v16 = vmul.f32 %v1880_v6, %v410_v63  ;;  %v565_v17 = vmul.f32 %v1884_v7, %v410_v63  ;;  %1359 = vmatprep.subr.bf16.mxu1 %v1193_v0  ;;  %v1014_v18 = vadd.f32 %v886_v54, %v630_v58  ;;  %v1012_v19 = vadd.f32 %v884_v56, %v628_v59  ;;  %v827_v56 = vld [vmem:[#allocation5 + $0x3d8] sm:$0xff]  ;;  %v825_v58 = vld [vmem:[#allocation5 + $0x3c8] sm:$0xff] }
 0x116   :  { %1247 = vmatpush1.bf16.xpose.msra.mxu0 %v1160_v11  ;;  %v1163_v24 = vpack.c.bf16 %v1015_v4, %v1013_v5  ;;  %v950_v25 = vmul.f32 %v822_v60, %v566_v14  ;;  %v951_v26 = vmul.f32 %v823_v8, %v567_v15  ;;  %v698_v60 = vld [vmem:[#allocation2 + $0x3d0] sm:$0xff]  ;;  %v699_v8 = vld [vmem:[#allocation2 + $0x3d8] sm:$0xff] }
 0x117   :  { %v948_v27 = vmul.f32 %v820_v9, %v564_v16  ;;  %v949_v28 = vmul.f32 %v821_v10, %v565_v17  ;;  %1360 = vmatpush1.bf16.xpose.msra.mxu1 %v1192_v3  ;;  %v265_v29 = vpop.permute.xlu1 %264  ;;  %v260_v32 = vpop.permute.xlu0 %259  ;;  %v1162_v59 = vpack.c.bf16 %v1014_v18, %v1012_v19  ;;  %v696_v9 = vld [vmem:[#allocation2 + $0x3c0] sm:$0xff]  ;;  %v697_v10 = vld [vmem:[#allocation2 + $0x3c8] sm:$0xff]  ;;  %v767_v16 = vld [vmem:[#allocation5 + $0x1f8] sm:$0xff] }
 0x118   :  { %v506_v33 = vmul.f32 %v1880_v6, %v265_v29  ;;  %v507_v34 = vmul.f32 %v1884_v7, %v265_v29  ;;  %v504_v35 = vmul.f32 %v1880_v6, %v260_v32  ;;  %v505_v36 = vmul.f32 %v1884_v7, %v260_v32  ;;  %1248 = vmatprep.subr.bf16.mxu0 %v1163_v24  ;;  %v765_v18 = vld [vmem:[#allocation5 + $0x1e8] sm:$0xff]  ;;  %v766_v29 = vld [vmem:[#allocation5 + $0x1f0] sm:$0xff] }
 0x119   :  { %v1078_v37 = vadd.f32 %v950_v25, %v694_v12  ;;  %v1079_v38 = vadd.f32 %v951_v26, %v695_v13  ;;  %v1076_v39 = vadd.f32 %v948_v27, %v692_v21  ;;  %v1077_v40 = vadd.f32 %v949_v28, %v693_v22  ;;  %v639_v21 = vld [vmem:[#allocation2 + $0x1f8] sm:$0xff] }
 0x11a   :  { %v890_v43 = vmul.f32 %v762_v23, %v506_v33  ;;  %v891_v44 = vmul.f32 %v763_v20, %v507_v34  ;;  %v888_v45 = vmul.f32 %v760_v30, %v504_v35  ;;  %v889_v46 = vmul.f32 %v761_v31, %v505_v36  ;;  %v637_v30 = vld [vmem:[#allocation2 + $0x1e8] sm:$0xff]  ;;  %v764_v31 = vld [vmem:[#allocation5 + $0x1e0] sm:$0xff]  ;;  %v830_v34 = vld [vmem:[#allocation5 + $0x3f0] sm:$0xff] }
 0x11b   :  { %v425_v50 = vpop.permute.xlu1 %424  ;;  %v420_v51 = vpop.permute.xlu0 %419  ;;  %v1195_v52 = vpack.c.bf16 %v1079_v38, %v1077_v40  ;;  %v1194_v53 = vpack.c.bf16 %v1078_v37, %v1076_v39 }
 0x11c   :  { %v1019_v54 = vadd.f32 %v891_v44, %v635_v41  ;;  %v1017_v55 = vadd.f32 %v889_v46, %v633_v42  ;;  %v570_v61 = vmul.f32 %v1880_v6, %v425_v50  ;;  %v571_v63 = vmul.f32 %v1884_v7, %v425_v50  ;;  %v831_v44 = vld [vmem:[#allocation5 + $0x3f8] sm:$0xff]  ;;  %v829_v46 = vld [vmem:[#allocation5 + $0x3e8] sm:$0xff] }
 0x11d   :  { %v568_v0 = vmul.f32 %v1880_v6, %v420_v51  ;;  %v569_v3 = vmul.f32 %v1884_v7, %v420_v51  ;;  %1361 = vmatprep.subr.bf16.mxu1 %v1195_v52  ;;  %v1018_v4 = vadd.f32 %v890_v43, %v634_v47  ;;  %v1016_v5 = vadd.f32 %v888_v45, %v632_v48  ;;  %v828_v45 = vld [vmem:[#allocation5 + $0x3e0] sm:$0xff]  ;;  %v638_v47 = vld [vmem:[#allocation2 + $0x1f0] sm:$0xff] }
 0x11e   :  { %1249 = vmatpush1.bf16.xpose.msra.mxu0 %v1162_v59  ;;  %v1165_v11 = vpack.c.bf16 %v1019_v54, %v1017_v55  ;;  %v954_v12 = vmul.f32 %v826_v49, %v570_v61  ;;  %v955_v13 = vmul.f32 %v827_v56, %v571_v63  ;;  %v636_v48 = vld [vmem:[#allocation2 + $0x1e0] sm:$0xff]  ;;  %v702_v49 = vld [vmem:[#allocation2 + $0x3f0] sm:$0xff]  ;;  %v703_v54 = vld [vmem:[#allocation2 + $0x3f8] sm:$0xff] }
 0x11f   :  { %v952_v14 = vmul.f32 %v824_v57, %v568_v0  ;;  %v953_v15 = vmul.f32 %v825_v58, %v569_v3  ;;  %1362 = vmatpush1.bf16.xpose.msra.mxu1 %v1194_v53  ;;  %v275_v17 = vpop.permute.xlu1 %274  ;;  %v270_v19 = vpop.permute.xlu0 %269  ;;  %v1164_v38 = vpack.c.bf16 %v1018_v4, %v1016_v5  ;;  %v700_v55 = vld [vmem:[#allocation2 + $0x3e0] sm:$0xff]  ;;  %v701_v56 = vld [vmem:[#allocation2 + $0x3e8] sm:$0xff] }
 0x120   :  { %v510_v22 = vmul.f32 %v1880_v6, %v275_v17  ;;  %v511_v23 = vmul.f32 %v1884_v7, %v275_v17  ;;  %v508_v24 = vmul.f32 %v1880_v6, %v270_v19  ;;  %v509_v25 = vmul.f32 %v1884_v7, %v270_v19  ;;  %1250 = vmatprep.subr.bf16.mxu0 %v1165_v11  ;;  %v1090_v11 = vld [vmem:[%s2206_s0 + $0x10] sm:$0xff]  ;;  %v1099_v19 = vld [vmem:[%s2206_s0 + $0x58] sm:$0xff] }
 0x121   :  { %v1082_v26 = vadd.f32 %v954_v12, %v698_v60  ;;  %v1083_v27 = vadd.f32 %v955_v13, %v699_v8  ;;  %v1080_v28 = vadd.f32 %v952_v14, %v696_v9  ;;  %v1081_v20 = vadd.f32 %v953_v15, %v697_v10  ;;  %v1088_v10 = vld [vmem:[%s2206_s0] sm:$0xff]  ;;  %v1093_v12 = vld [vmem:[%s2206_s0 + $0x28] sm:$0xff]  ;;  %v1095_v13 = vld [vmem:[%s2206_s0 + $0x38] sm:$0xff] }
 0x122   :  { %v895_v32 = vmul.f32 %v767_v16, %v511_v23  ;;  %v893_v33 = vmul.f32 %v765_v18, %v509_v25  ;;  %v894_v40 = vmul.f32 %v766_v29, %v510_v22  ;;  %v892_v42 = vmul.f32 %v764_v31, %v508_v24  ;;  %v1092_v16 = vld [vmem:[%s2206_s0 + $0x20] sm:$0xff]  ;;  %v1094_v17 = vld [vmem:[%s2206_s0 + $0x30] sm:$0xff]  ;;  %v1097_v18 = vld [vmem:[%s2206_s0 + $0x48] sm:$0xff] }
 0x123   :  { %v435_v35 = vpop.permute.xlu1 %434  ;;  %v430_v36 = vpop.permute.xlu0 %429  ;;  %v1197_v37 = vpack.c.bf16 %v1083_v27, %v1081_v20  ;;  %v1196_v39 = vpack.c.bf16 %v1082_v26, %v1080_v28  ;;  %v1120_v14 = vpack.c.bf16 %v1090_v11, %v1088_v10  ;;  %v1123_v15 = vpack.c.bf16 %v1095_v13, %v1093_v12  ;;  %v1096_v23 = vld [vmem:[%s2206_s0 + $0x40] sm:$0xff]  ;;  %v1098_v24 = vld [vmem:[%s2206_s0 + $0x50] sm:$0xff]  ;;  %v1101_v25 = vld [vmem:[%s2206_s0 + $0x68] sm:$0xff] }
 0x124   :  { %v1023_v41 = vadd.f32 %v895_v32, %v639_v21  ;;  %v1021_v43 = vadd.f32 %v893_v33, %v637_v30  ;;  %v574_v50 = vmul.f32 %v1880_v6, %v435_v35  ;;  %v575_v51 = vmul.f32 %v1884_v7, %v435_v35  ;;  %v1103_v26 = vld [vmem:[%s2206_s0 + $0x78] sm:$0xff]  ;;  %v1100_v20 = vld [vmem:[%s2206_s0 + $0x60] sm:$0xff]  ;;  %v1102_v29 = vld [vmem:[%s2206_s0 + $0x70] sm:$0xff] }
 0x125   :  { %v572_v52 = vmul.f32 %v1880_v6, %v430_v36  ;;  %v573_v53 = vmul.f32 %v1884_v7, %v430_v36  ;;  %1363 = vmatprep.subr.bf16.mxu1 %v1197_v37  ;;  %v1022_v63 = vadd.f32 %v894_v40, %v638_v47  ;;  %v1020_v0 = vadd.f32 %v892_v42, %v636_v48  ;;  %v1105_v30 = vld [vmem:[%s2206_s0 + $0x88] sm:$0xff]  ;;  %v1107_v31 = vld [vmem:[%s2206_s0 + $0x98] sm:$0xff]  ;;  %v1106_v35 = vld [vmem:[%s2206_s0 + $0x90] sm:$0xff] }
 0x126   :  { %1251 = vmatpush1.bf16.xpose.msra.mxu0 %v1164_v38  ;;  %v1167_v57 = vpack.c.bf16 %v1023_v41, %v1021_v43  ;;  %v958_v58 = vmul.f32 %v830_v34, %v574_v50  ;;  %v959_v59 = vmul.f32 %v831_v44, %v575_v51  ;;  %v1122_v21 = vpack.c.bf16 %v1094_v17, %v1092_v16  ;;  %v1104_v34 = vld [vmem:[%s2206_s0 + $0x80] sm:$0xff]  ;;  %v1109_v36 = vld [vmem:[%s2206_s0 + $0xa8] sm:$0xff]  ;;  %v1111_v37 = vld [vmem:[%s2206_s0 + $0xb8] sm:$0xff] }
 0x127   :  { %v956_v60 = vmul.f32 %v828_v45, %v572_v52  ;;  %v957_v61 = vmul.f32 %v829_v46, %v573_v53  ;;  %1364 = vmatpush1.bf16.xpose.msra.mxu1 %v1196_v39  ;;  %v1166_v9 = vpack.c.bf16 %v1022_v63, %v1020_v0  ;;  %v1125_v22 = vpack.c.bf16 %v1099_v19, %v1097_v18  ;;  %v1108_v40 = vld [vmem:[%s2206_s0 + $0xa0] sm:$0xff]  ;;  %v1110_v41 = vld [vmem:[%s2206_s0 + $0xb0] sm:$0xff]  ;;  %v1113_v42 = vld [vmem:[%s2206_s0 + $0xc8] sm:$0xff] }
 0x128   :  { %1252 = vmatprep.subr.bf16.mxu0 %v1167_v57  ;;  %v1086_v3 = vadd.f32 %v958_v58, %v702_v49  ;;  %v1087_v4 = vadd.f32 %v959_v59, %v703_v54  ;;  %v1124_v27 = vpack.c.bf16 %v1098_v24, %v1096_v23  ;;  %v1127_v28 = vpack.c.bf16 %v1103_v26, %v1101_v25  ;;  %v1115_v43 = vld [vmem:[%s2206_s0 + $0xd8] sm:$0xff]  ;;  %v1112_v46 = vld [vmem:[%s2206_s0 + $0xc0] sm:$0xff]  ;;  %v1114_v47 = vld [vmem:[%s2206_s0 + $0xd0] sm:$0xff] }
 0x129   :  { %v1084_v5 = vadd.f32 %v956_v60, %v700_v55  ;;  %v1085_v6 = vadd.f32 %v957_v61, %v701_v56  ;;  %v1126_v32 = vpack.c.bf16 %v1102_v29, %v1100_v20  ;;  %v1129_v33 = vpack.c.bf16 %v1107_v31, %v1105_v30  ;;  %v1117_v48 = vld [vmem:[%s2206_s0 + $0xe8] sm:$0xff]  ;;  %v1119_v49 = vld [vmem:[%s2206_s0 + $0xf8] sm:$0xff]  ;;  %v1116_v52 = vld [vmem:[%s2206_s0 + $0xe0] sm:$0xff] }
 0x12a   :  { %v1128_v38 = vpack.c.bf16 %v1106_v35, %v1104_v34  ;;  %v1131_v39 = vpack.c.bf16 %v1111_v37, %v1109_v36  ;;  %v1130_v44 = vpack.c.bf16 %v1110_v41, %v1108_v40  ;;  %v1133_v45 = vpack.c.bf16 %v1115_v43, %v1113_v42  ;;  %v1118_v53 = vld [vmem:[%s2206_s0 + $0xf0] sm:$0xff]  ;;  %v1200_v55 = vld [vmem:[%s2211_s5] sm:$0xf]  ;;  %s1617_s0 = smov [#allocation7]  }
 0x12b   :  { %v1199_v8 = vpack.c.bf16 %v1087_v4, %v1085_v6  ;;  %v1198_v7 = vpack.c.bf16 %v1086_v3, %v1084_v5  ;;  %v1132_v50 = vpack.c.bf16 %v1114_v47, %v1112_v46  ;;  %v1135_v51 = vpack.c.bf16 %v1119_v49, %v1117_v48  ;;  %s1517_s5 = sshll.u32 %s1617_s0, 4  ;;  %s1518_s5 = int_to_ptr.vmem [resolvable:$true] %s1517_s5 }
 0x12c   :  { %v1134_v54 = vpack.c.bf16 %v1118_v53, %v1116_v52  ;;  %v1212_v56 = vsub.s32 2, %v1859_v62  ;;  %v1216_v57 = vsub.s32 3, %v1859_v62  ;;  %v2120_v58 = vrot.slane %v1200_v55, %v440_v1  ;;  %s1584_s29 = scalar_lea.vmem %s1518_s5, 8192  ;;  %p1589_p3 = scmp.lt.s32.totalorder %s1518_s5, %s1518_s5 }
 0x12d   :  { %1365 = vmatprep.subr.bf16.mxu1 %v1199_v8  ;;  %v2126_v60 = vrot.slane %v1200_v55, %v444_v2  ;;  %p1585_p2 = scmp.ne.s32.totalorder %s1518_s5, %s1584_s29  ;;  %p1590_p4 = scmp.lt.s32.totalorder %s1584_s29, %s1584_s29 }
 0x12e   :  { %1253 = vmatpush1.bf16.xpose.msra.mxu0 %v1166_v9  ;;  %v2122_v59 = vrot.slane %v1200_v55, %v1212_v56  ;;  %v2128_v61 = vrot.slane %v1200_v55, %v1216_v57 }
 0x12f   :  { %1366 = vmatpush1.bf16.xpose.msra.mxu1 %v1198_v7  ;;  %p1591_p5 = por %p1590_p4, %p1589_p3 }
 0x131   :  { %p1592_p6 = pnand %p1591_p5, %p1585_p2 }
 0x135   :  { %1255 = vmatmul.mubr.bf16.vlgmr.msra.gmra.mrb[0].mxu0 %v1120_v14 }
 0x136   :  { %1368 = vmatmul.mubr.bf16.vlgmr.msra.gmra.mrb[0].mxu1 %v1120_v14  ;;  %1264 = vmatprep.mubr.bf16.mxu0 %v1123_v15 }
 0x137   :  { %1377 = vmatprep.mubr.bf16.mxu1 %v1123_v15 }
 0x13d   :  { %1265 = vmatmul.mubr.bf16.gmra.mrb[4].mxu0 %v1122_v21 }
 0x13e   :  { %1378 = vmatmul.mubr.bf16.gmra.mrb[4].mxu1 %v1122_v21  ;;  %1274 = vmatprep.mubr.bf16.mxu0 %v1125_v22 }
 0x13f   :  { %1387 = vmatprep.mubr.bf16.mxu1 %v1125_v22 }
 0x145   :  { %1275 = vmatmul.mubr.bf16.gmra.mrb[8].mxu0 %v1124_v27 }
 0x146   :  { %1388 = vmatmul.mubr.bf16.gmra.mrb[8].mxu1 %v1124_v27  ;;  %1284 = vmatprep.mubr.bf16.mxu0 %v1127_v28 }
 0x147   :  { %1397 = vmatprep.mubr.bf16.mxu1 %v1127_v28 }
 0x14d   :  { %1285 = vmatmul.mubr.bf16.gmra.mrb[12].mxu0 %v1126_v32 }
 0x14e   :  { %1398 = vmatmul.mubr.bf16.gmra.mrb[12].mxu1 %v1126_v32  ;;  %1294 = vmatprep.mubr.bf16.mxu0 %v1129_v33 }
 0x14f   :  { %1407 = vmatprep.mubr.bf16.mxu1 %v1129_v33 }
 0x155   :  { %1295 = vmatmul.mubr.bf16.gmra.mrb[16].mxu0 %v1128_v38 }
 0x156   :  { %1408 = vmatmul.mubr.bf16.gmra.mrb[16].mxu1 %v1128_v38  ;;  %1304 = vmatprep.mubr.bf16.mxu0 %v1131_v39 }
 0x157   :  { %1417 = vmatprep.mubr.bf16.mxu1 %v1131_v39 }
 0x15d   :  { %1305 = vmatmul.mubr.bf16.gmra.mrb[20].mxu0 %v1130_v44 }
 0x15e   :  { %1418 = vmatmul.mubr.bf16.gmra.mrb[20].mxu1 %v1130_v44  ;;  %1314 = vmatprep.mubr.bf16.mxu0 %v1133_v45 }
 0x15f   :  { %1427 = vmatprep.mubr.bf16.mxu1 %v1133_v45 }
 0x165   :  { %1315 = vmatmul.mubr.bf16.gmra.mrb[24].mxu0 %v1132_v50 }
 0x166   :  { %1428 = vmatmul.mubr.bf16.gmra.mrb[24].mxu1 %v1132_v50  ;;  %1324 = vmatprep.mubr.bf16.mxu0 %v1135_v51 }
 0x167   :  { %1437 = vmatprep.mubr.bf16.mxu1 %v1135_v51 }
 0x16d   :  { %1325 = vmatmul.mubr.bf16.gmra.mrb[28].mxu0 %v1134_v54 }
 0x16e   :  { %1438 = vmatmul.mubr.bf16.gmra.mrb[28].mxu1 %v1134_v54 }
 0x208   :  { %v1256_v63 = vpop.f32.mrb[0].mxu0 }
 0x209   :  { %v1257_v0 = vadd.f32 %v1256_v63, %v2120_v58  ;;  %v1369_v3 = vpop.f32.mrb[0].mxu1  ;;  %v1258_v4 = vpop.f32.mrb[1].mxu0 }
 0x20a   :  { %v1370_v5 = vadd.f32 %v1369_v3, %v2122_v59  ;;  %v1259_v6 = vadd.f32 %v1258_v4, %v2126_v60  ;;  %v1371_v8 = vpop.f32.mrb[1].mxu1  ;;  %v1260_v1 = vpop.f32.mrb[2].mxu0 }
 0x20b   :  { %1448 = vst [vmem:[#allocation7] sm:$0xff] %v1257_v0  ;;  %v1372_v7 = vadd.f32 %v1371_v8, %v2128_v61  ;;  %v1261_v62 = vadd.f32 %v1260_v1, %v2120_v58  ;;  %v1373_v2 = vpop.f32.mrb[2].mxu1  ;;  %v1262_v9 = vpop.f32.mrb[3].mxu0 }
 0x20c   :  { %1450 = vst [vmem:[#allocation7 + $0x10] sm:$0xff] %v1370_v5  ;;  %1449 = vst [vmem:[#allocation7 + $0x8] sm:$0xff] %v1259_v6  ;;  %v1374_v10 = vadd.f32 %v1373_v2, %v2122_v59  ;;  %v1263_v11 = vadd.f32 %v1262_v9, %v2126_v60  ;;  %v1375_v12 = vpop.f32.mrb[3].mxu1 }
 0x20d   :  { %1451 = vst [vmem:[#allocation7 + $0x18] sm:$0xff] %v1372_v7  ;;  %1452 = vst [vmem:[#allocation7 + $0x20] sm:$0xff] %v1261_v62  ;;  %v1376_v13 = vadd.f32 %v1375_v12, %v2128_v61 }
 0x20e   :  { %1454 = vst [vmem:[#allocation7 + $0x30] sm:$0xff] %v1374_v10  ;;  %1453 = vst [vmem:[#allocation7 + $0x28] sm:$0xff] %v1263_v11 }
 0x20f   :  { %1455 = vst [vmem:[#allocation7 + $0x38] sm:$0xff] %v1376_v13 }
 0x210   :  { %v1266_v14 = vpop.f32.mrb[4].mxu0 }
 0x211   :  { %v1267_v15 = vadd.f32 %v1266_v14, %v2120_v58  ;;  %v1379_v16 = vpop.f32.mrb[4].mxu1  ;;  %v1268_v17 = vpop.f32.mrb[5].mxu0 }
 0x212   :  { %v1380_v18 = vadd.f32 %v1379_v16, %v2122_v59  ;;  %v1269_v19 = vadd.f32 %v1268_v17, %v2126_v60  ;;  %v1381_v21 = vpop.f32.mrb[5].mxu1  ;;  %v1270_v22 = vpop.f32.mrb[6].mxu0 }
 0x213   :  { %1456 = vst [vmem:[#allocation7 + $0x40] sm:$0xff] %v1267_v15  ;;  %v1382_v23 = vadd.f32 %v1381_v21, %v2128_v61  ;;  %v1271_v24 = vadd.f32 %v1270_v22, %v2120_v58  ;;  %v1383_v25 = vpop.f32.mrb[6].mxu1  ;;  %v1272_v26 = vpop.f32.mrb[7].mxu0 }
 0x214   :  { %1458 = vst [vmem:[#allocation7 + $0x50] sm:$0xff] %v1380_v18  ;;  %1457 = vst [vmem:[#allocation7 + $0x48] sm:$0xff] %v1269_v19  ;;  %v1384_v27 = vadd.f32 %v1383_v25, %v2122_v59  ;;  %v1273_v28 = vadd.f32 %v1272_v26, %v2126_v60  ;;  %v1385_v20 = vpop.f32.mrb[7].mxu1 }
 0x215   :  { %1459 = vst [vmem:[#allocation7 + $0x58] sm:$0xff] %v1382_v23  ;;  %1460 = vst [vmem:[#allocation7 + $0x60] sm:$0xff] %v1271_v24  ;;  %v1386_v29 = vadd.f32 %v1385_v20, %v2128_v61 }
 0x216   :  { %1462 = vst [vmem:[#allocation7 + $0x70] sm:$0xff] %v1384_v27  ;;  %1461 = vst [vmem:[#allocation7 + $0x68] sm:$0xff] %v1273_v28 }
 0x217   :  { %1463 = vst [vmem:[#allocation7 + $0x78] sm:$0xff] %v1386_v29 }
 0x218   :  { %v1276_v30 = vpop.f32.mrb[8].mxu0 }
 0x219   :  { %v1277_v31 = vadd.f32 %v1276_v30, %v2120_v58  ;;  %v1389_v32 = vpop.f32.mrb[8].mxu1  ;;  %v1278_v33 = vpop.f32.mrb[9].mxu0 }
 0x21a   :  { %v1390_v34 = vadd.f32 %v1389_v32, %v2122_v59  ;;  %v1279_v35 = vadd.f32 %v1278_v33, %v2126_v60  ;;  %v1391_v36 = vpop.f32.mrb[9].mxu1  ;;  %v1280_v37 = vpop.f32.mrb[10].mxu0 }
 0x21b   :  { %1464 = vst [vmem:[#allocation7 + $0x80] sm:$0xff] %v1277_v31  ;;  %v1392_v38 = vadd.f32 %v1391_v36, %v2128_v61  ;;  %v1281_v39 = vadd.f32 %v1280_v37, %v2120_v58  ;;  %v1393_v40 = vpop.f32.mrb[10].mxu1  ;;  %v1282_v41 = vpop.f32.mrb[11].mxu0 }
 0x21c   :  { %1466 = vst [vmem:[#allocation7 + $0x90] sm:$0xff] %v1390_v34  ;;  %1465 = vst [vmem:[#allocation7 + $0x88] sm:$0xff] %v1279_v35  ;;  %v1394_v42 = vadd.f32 %v1393_v40, %v2122_v59  ;;  %v1283_v43 = vadd.f32 %v1282_v41, %v2126_v60  ;;  %v1395_v44 = vpop.f32.mrb[11].mxu1 }
 0x21d   :  { %1467 = vst [vmem:[#allocation7 + $0x98] sm:$0xff] %v1392_v38  ;;  %1468 = vst [vmem:[#allocation7 + $0xa0] sm:$0xff] %v1281_v39  ;;  %v1396_v45 = vadd.f32 %v1395_v44, %v2128_v61 }
 0x21e   :  { %1470 = vst [vmem:[#allocation7 + $0xb0] sm:$0xff] %v1394_v42  ;;  %1469 = vst [vmem:[#allocation7 + $0xa8] sm:$0xff] %v1283_v43 }
 0x21f   :  { %1471 = vst [vmem:[#allocation7 + $0xb8] sm:$0xff] %v1396_v45 }
 0x220   :  { %v1286_v46 = vpop.f32.mrb[12].mxu0 }
 0x221   :  { %v1287_v47 = vadd.f32 %v1286_v46, %v2120_v58  ;;  %v1399_v48 = vpop.f32.mrb[12].mxu1  ;;  %v1288_v49 = vpop.f32.mrb[13].mxu0 }
 0x222   :  { %v1400_v50 = vadd.f32 %v1399_v48, %v2122_v59  ;;  %v1289_v51 = vadd.f32 %v1288_v49, %v2126_v60  ;;  %v1401_v52 = vpop.f32.mrb[13].mxu1  ;;  %v1290_v53 = vpop.f32.mrb[14].mxu0 }
 0x223   :  { %1472 = vst [vmem:[#allocation7 + $0xc0] sm:$0xff] %v1287_v47  ;;  %v1402_v54 = vadd.f32 %v1401_v52, %v2128_v61  ;;  %v1291_v55 = vadd.f32 %v1290_v53, %v2120_v58  ;;  %v1403_v56 = vpop.f32.mrb[14].mxu1  ;;  %v1292_v57 = vpop.f32.mrb[15].mxu0 }
 0x224   :  { %1474 = vst [vmem:[#allocation7 + $0xd0] sm:$0xff] %v1400_v50  ;;  %1473 = vst [vmem:[#allocation7 + $0xc8] sm:$0xff] %v1289_v51  ;;  %v1404_v63 = vadd.f32 %v1403_v56, %v2122_v59  ;;  %v1293_v0 = vadd.f32 %v1292_v57, %v2126_v60  ;;  %v1405_v3 = vpop.f32.mrb[15].mxu1 }
 0x225   :  { %1475 = vst [vmem:[#allocation7 + $0xd8] sm:$0xff] %v1402_v54  ;;  %1476 = vst [vmem:[#allocation7 + $0xe0] sm:$0xff] %v1291_v55  ;;  %v1406_v4 = vadd.f32 %v1405_v3, %v2128_v61 }
 0x226   :  { %1478 = vst [vmem:[#allocation7 + $0xf0] sm:$0xff] %v1404_v63  ;;  %1477 = vst [vmem:[#allocation7 + $0xe8] sm:$0xff] %v1293_v0 }
 0x227   :  { %1479 = vst [vmem:[#allocation7 + $0xf8] sm:$0xff] %v1406_v4 }
 0x228   :  { %v1296_v5 = vpop.f32.mrb[16].mxu0 }
 0x229   :  { %v1297_v6 = vadd.f32 %v1296_v5, %v2120_v58  ;;  %v1409_v8 = vpop.f32.mrb[16].mxu1  ;;  %v1298_v1 = vpop.f32.mrb[17].mxu0 }
 0x22a   :  { %v1410_v7 = vadd.f32 %v1409_v8, %v2122_v59  ;;  %v1299_v62 = vadd.f32 %v1298_v1, %v2126_v60  ;;  %v1411_v2 = vpop.f32.mrb[17].mxu1  ;;  %v1300_v9 = vpop.f32.mrb[18].mxu0 }
 0x22b   :  { %1480 = vst [vmem:[#allocation7 + $0x100] sm:$0xff] %v1297_v6  ;;  %v1412_v10 = vadd.f32 %v1411_v2, %v2128_v61  ;;  %v1301_v11 = vadd.f32 %v1300_v9, %v2120_v58  ;;  %v1413_v12 = vpop.f32.mrb[18].mxu1  ;;  %v1302_v13 = vpop.f32.mrb[19].mxu0 }
 0x22c   :  { %1482 = vst [vmem:[#allocation7 + $0x110] sm:$0xff] %v1410_v7  ;;  %1481 = vst [vmem:[#allocation7 + $0x108] sm:$0xff] %v1299_v62  ;;  %v1414_v14 = vadd.f32 %v1413_v12, %v2122_v59  ;;  %v1303_v15 = vadd.f32 %v1302_v13, %v2126_v60  ;;  %v1415_v16 = vpop.f32.mrb[19].mxu1 }
 0x22d   :  { %1483 = vst [vmem:[#allocation7 + $0x118] sm:$0xff] %v1412_v10  ;;  %1484 = vst [vmem:[#allocation7 + $0x120] sm:$0xff] %v1301_v11  ;;  %v1416_v17 = vadd.f32 %v1415_v16, %v2128_v61 }
 0x22e   :  { %1486 = vst [vmem:[#allocation7 + $0x130] sm:$0xff] %v1414_v14  ;;  %1485 = vst [vmem:[#allocation7 + $0x128] sm:$0xff] %v1303_v15 }
 0x22f   :  { %1487 = vst [vmem:[#allocation7 + $0x138] sm:$0xff] %v1416_v17 }
 0x230   :  { %v1306_v18 = vpop.f32.mrb[20].mxu0 }
 0x231   :  { %v1307_v19 = vadd.f32 %v1306_v18, %v2120_v58  ;;  %v1419_v21 = vpop.f32.mrb[20].mxu1  ;;  %v1308_v22 = vpop.f32.mrb[21].mxu0 }
 0x232   :  { %v1420_v23 = vadd.f32 %v1419_v21, %v2122_v59  ;;  %v1309_v24 = vadd.f32 %v1308_v22, %v2126_v60  ;;  %v1421_v25 = vpop.f32.mrb[21].mxu1  ;;  %v1310_v26 = vpop.f32.mrb[22].mxu0 }
 0x233   :  { %1488 = vst [vmem:[#allocation7 + $0x140] sm:$0xff] %v1307_v19  ;;  %v1422_v27 = vadd.f32 %v1421_v25, %v2128_v61  ;;  %v1311_v28 = vadd.f32 %v1310_v26, %v2120_v58  ;;  %v1423_v20 = vpop.f32.mrb[22].mxu1  ;;  %v1312_v29 = vpop.f32.mrb[23].mxu0 }
 0x234   :  { %1490 = vst [vmem:[#allocation7 + $0x150] sm:$0xff] %v1420_v23  ;;  %1489 = vst [vmem:[#allocation7 + $0x148] sm:$0xff] %v1309_v24  ;;  %v1424_v30 = vadd.f32 %v1423_v20, %v2122_v59  ;;  %v1313_v31 = vadd.f32 %v1312_v29, %v2126_v60  ;;  %v1425_v32 = vpop.f32.mrb[23].mxu1 }
 0x235   :  { %1491 = vst [vmem:[#allocation7 + $0x158] sm:$0xff] %v1422_v27  ;;  %1492 = vst [vmem:[#allocation7 + $0x160] sm:$0xff] %v1311_v28  ;;  %v1426_v33 = vadd.f32 %v1425_v32, %v2128_v61 }
 0x236   :  { %1494 = vst [vmem:[#allocation7 + $0x170] sm:$0xff] %v1424_v30  ;;  %1493 = vst [vmem:[#allocation7 + $0x168] sm:$0xff] %v1313_v31 }
 0x237   :  { %1495 = vst [vmem:[#allocation7 + $0x178] sm:$0xff] %v1426_v33 }
 0x238   :  { %v1316_v34 = vpop.f32.mrb[24].mxu0 }
 0x239   :  { %v1317_v35 = vadd.f32 %v1316_v34, %v2120_v58  ;;  %v1429_v36 = vpop.f32.mrb[24].mxu1  ;;  %v1318_v37 = vpop.f32.mrb[25].mxu0 }
 0x23a   :  { %v1430_v38 = vadd.f32 %v1429_v36, %v2122_v59  ;;  %v1319_v39 = vadd.f32 %v1318_v37, %v2126_v60  ;;  %v1431_v40 = vpop.f32.mrb[25].mxu1  ;;  %v1320_v41 = vpop.f32.mrb[26].mxu0 }
 0x23b   :  { %1496 = vst [vmem:[#allocation7 + $0x180] sm:$0xff] %v1317_v35  ;;  %v1432_v42 = vadd.f32 %v1431_v40, %v2128_v61  ;;  %v1321_v43 = vadd.f32 %v1320_v41, %v2120_v58  ;;  %v1433_v44 = vpop.f32.mrb[26].mxu1  ;;  %v1322_v45 = vpop.f32.mrb[27].mxu0 }
 0x23c   :  { %1498 = vst [vmem:[#allocation7 + $0x190] sm:$0xff] %v1430_v38  ;;  %1497 = vst [vmem:[#allocation7 + $0x188] sm:$0xff] %v1319_v39  ;;  %v1434_v46 = vadd.f32 %v1433_v44, %v2122_v59  ;;  %v1323_v47 = vadd.f32 %v1322_v45, %v2126_v60  ;;  %v1435_v48 = vpop.f32.mrb[27].mxu1 }
 0x23d   :  { %1499 = vst [vmem:[#allocation7 + $0x198] sm:$0xff] %v1432_v42  ;;  %1500 = vst [vmem:[#allocation7 + $0x1a0] sm:$0xff] %v1321_v43  ;;  %v1436_v49 = vadd.f32 %v1435_v48, %v2128_v61 }
 0x23e   :  { %1502 = vst [vmem:[#allocation7 + $0x1b0] sm:$0xff] %v1434_v46  ;;  %1501 = vst [vmem:[#allocation7 + $0x1a8] sm:$0xff] %v1323_v47 }
 0x23f   :  { %1503 = vst [vmem:[#allocation7 + $0x1b8] sm:$0xff] %v1436_v49 }
 0x240   :  { %v1326_v50 = vpop.f32.mrb[28].mxu0 }
 0x241   :  { %v1327_v51 = vadd.f32 %v1326_v50, %v2120_v58  ;;  %v1439_v52 = vpop.f32.mrb[28].mxu1  ;;  %v1328_v53 = vpop.f32.mrb[29].mxu0 }
 0x242   :  { %v1440_v54 = vadd.f32 %v1439_v52, %v2122_v59  ;;  %v1329_v55 = vadd.f32 %v1328_v53, %v2126_v60  ;;  %v1441_v56 = vpop.f32.mrb[29].mxu1  ;;  %v1330_v57 = vpop.f32.mrb[30].mxu0 }
 0x243   :  { %1504 = vst [vmem:[#allocation7 + $0x1c0] sm:$0xff] %v1327_v51  ;;  %v1442_v63 = vadd.f32 %v1441_v56, %v2128_v61  ;;  %v1331_v0 = vadd.f32 %v1330_v57, %v2120_v58  ;;  %v1443_v3 = vpop.f32.mrb[30].mxu1  ;;  %v1332_v4 = vpop.f32.mrb[31].mxu0 }
 0x244   :  { %1506 = vst [vmem:[#allocation7 + $0x1d0] sm:$0xff] %v1440_v54  ;;  %1505 = vst [vmem:[#allocation7 + $0x1c8] sm:$0xff] %v1329_v55  ;;  %v1444_v5 = vadd.f32 %v1443_v3, %v2122_v59  ;;  %v1333_v6 = vadd.f32 %v1332_v4, %v2126_v60  ;;  %v1445_v8 = vpop.f32.mrb[31].mxu1 }
 0x245   :  { %1507 = vst [vmem:[#allocation7 + $0x1d8] sm:$0xff] %v1442_v63  ;;  %1508 = vst [vmem:[#allocation7 + $0x1e0] sm:$0xff] %v1331_v0  ;;  %v1446_v1 = vadd.f32 %v1445_v8, %v2128_v61 }
 0x246   :  { %1510 = vst [vmem:[#allocation7 + $0x1f0] sm:$0xff] %v1444_v5  ;;  %1509 = vst [vmem:[#allocation7 + $0x1e8] sm:$0xff] %v1333_v6 }
 0x247   :  { %1511 = vst [vmem:[#allocation7 + $0x1f8] sm:$0xff] %v1446_v1 }
 0x248   :  { %1595 = shalt.err (!%p1592_p6)
}
 0x249   :  { %s1596_s8 = scalar_lea.hbm %s2212_s6, 8192 }
 0x24a   :  { %p1597_p7 = scmp.ne.s32.totalorder %s2212_s6, %s1596_s8  ;;  %p1600_p8 = scmp.lt.u32.totalorder %s1596_s8, %s2212_s6 }
 0x24c   :  { %p1602_p9 = pnand %p1600_p8, %p1597_p7 }
 0x24e   :  { %1605 = shalt.err (!%p1602_p9)
}
 0x24f   :  { %s1618_s13 = smov 512   ;;  %s1619_s14 = smov 32  }
 0x250   :  { %1523 = dma.vmem_to_hbm [thread:$0]  %s1518_s5, 8192, %s2212_s6, [#allocation4], %s1618_s13, %s1618_s13, %s1619_s14  }
 0x251   :  { %1610 = dma.done.wait [#allocation4], 8192  }
 0x252   :  { %1611 = vsyncadd [#allocation4], 4294959104 }
 0x253   :  { %1527 = vsyncpa [#allocation3], 1 }
 0x254   :  { %1528 = vsyncpa [#allocation6], 1 }
 0x255   :  { %1529 = vsyncpa [#allocation4], 1 }

</bundles_post_ra>
